<compile_context>
chip_gen: v7x
topology: tpu7x:2x2x1
jax: 0.10.0
libtpu: 0.0.40
codegen_flags: <defaults>
</compile_context>

<pallas_src>
import jax
import jax.numpy as jnp
from jax.experimental import pallas as pl
from jax.experimental.pallas import tpu as pltpu


def _round_up(v, m):
    return ((v + m - 1) // m) * m


def _onehot_dict_kernel(x_ref, w_ref, o_ref):
    # x_ref: (TM, V) row tile; w_ref: (V, E_p) resident dictionary; o_ref: (TM, E_p)
    x = x_ref[...]
    vocab = x.shape[-1]

    # argmax over last axis with first-occurrence tie break, expressed as
    # lane-iota + min over candidate indices (pure VPU/XLU work).
    iota = jax.lax.broadcasted_iota(jnp.int32, x.shape, 1)          # (TM, V)
    max_val = jnp.max(x, axis=-1, keepdims=True)                    # (TM, 1)
    cand = jnp.where(x == max_val, iota, vocab)                     # (TM, V)
    first_idx = jnp.min(cand, axis=-1, keepdims=True)               # (TM, 1)

    # One-hot of the argmax index, then embedding lookup as an MXU matmul.
    onehot = (iota == first_idx).astype(w_ref.dtype)                # (TM, V)
    out = jnp.dot(onehot, w_ref[...], preferred_element_type=jnp.float32)
    o_ref[...] = out.astype(o_ref.dtype)


def one_hot_dictionary(x, weight, *, tm=512, vmem_limit_bytes=64 * 1024 * 1024):
    """
    x:      (B, N, V) float
    weight: (V, E)    float  (nn.Embedding weight)
    returns (B, N, E)
    """
    B, N, V = x.shape
    Vw, E = weight.shape
    assert V == Vw

    rows = B * N
    itemsize = jnp.dtype(weight.dtype).itemsize

    # Lane-dense output: pad E up to a multiple of 128 (unmasked vector stores).
    E_p = _round_up(E, 128)

    # Pick the row tile: multiple of 128, as large as possible (<= tm) such
    # that double-buffered x/out tiles + the single-buffered resident
    # dictionary fit a conservative VMEM budget.
    budget = int(vmem_limit_bytes * 3 // 4)
    w_bytes = V * E_p * itemsize
    tm_eff = max(128, min(_round_up(tm, 128), _round_up(rows, 128)))
    while tm_eff > 128:
        tile_bytes = 2 * tm_eff * V * itemsize + 2 * tm_eff * E_p * itemsize
        if tile_bytes + w_bytes <= budget:
            break
        tm_eff -= 128
    rows_p = _round_up(rows, tm_eff)

    # TODO(synk): for very large dictionaries (V*E_p f32 of tens of MiB) add an
    # E-tiling grid axis so the weight block also fits v7x's 64 MiB VMEM.

    x2 = x.reshape(rows, V)
    if rows_p != rows:
        x2 = jnp.pad(x2, ((0, rows_p - rows), (0, 0)))
    w = weight if E_p == E else jnp.pad(weight, ((0, 0), (0, E_p - E)))

    def _call(single_buffer_weight):
        if single_buffer_weight:
            w_spec = pl.BlockSpec((V, E_p), lambda i: (0, 0),
                                  pipeline_mode=pl.Buffered(1))
        else:
            w_spec = pl.BlockSpec((V, E_p), lambda i: (0, 0))
        return pl.pallas_call(
            _onehot_dict_kernel,
            out_shape=jax.ShapeDtypeStruct((rows_p, E_p), weight.dtype),
            grid_spec=pltpu.PrefetchScalarGridSpec(
                num_scalar_prefetch=0,
                grid=(rows_p // tm_eff,),
                in_specs=[
                    pl.BlockSpec((tm_eff, V), lambda i: (i, 0)),   # row tile of x
                    w_spec,                                        # resident dictionary
                ],
                out_specs=pl.BlockSpec((tm_eff, E_p), lambda i: (i, 0)),
            ),
            compiler_params=pltpu.CompilerParams(
                dimension_semantics=("parallel",),
                vmem_limit_bytes=vmem_limit_bytes),
        )(x2, w)

    try:
        out = _call(single_buffer_weight=True)
    except Exception:
        # Fallback if this jax version rejects single-buffered pipeline_mode.
        out = _call(single_buffer_weight=False)

    return out[:rows, :E].reshape(B, N, E)


if __name__ == "__main__":
    # Small shapes consistent with the module's forward: x is (B, N, vocab_size).
    B, N, vocab_size, emb_size = 2, 8, 32, 32

    key = jax.random.PRNGKey(0)
    kx, kw = jax.random.split(key)

    x = jax.random.normal(kx, (B, N, vocab_size), dtype=jnp.float32)
    # nn.Embedding default init: N(0, 1)
    dict_weight = jax.random.normal(kw, (vocab_size, emb_size), dtype=jnp.float32)

    out = one_hot_dictionary(x, dict_weight)
    out = jax.block_until_ready(out)

    # Pure-JAX reference: argmax -> take
    ref = jnp.take(dict_weight, jnp.argmax(x, axis=-1), axis=0)
    assert out.shape == (B, N, emb_size)
    assert jnp.allclose(out, ref), "mismatch vs reference"

    print("KERNEL_OK")
</pallas_src>

<mosaic_0001>
module attributes {stable_mosaic.version = 11 : i64} {
  func.func @_onehot_dict_kernel(%arg0: i32, %arg1: memref<128x32xf32, #tpu.memory_space<vmem>>, %arg2: memref<32x128xf32, #tpu.memory_space<vmem>>, %arg3: memref<128x128xf32, #tpu.memory_space<vmem>>) attributes {dimension_semantics = [#tpu.dimension_semantics<parallel>], iteration_bounds = array<i64: 1>, scalar_prefetch = 0 : i64, scratch_operands = 0 : i64, tpu.core_type = #tpu.core_type<tc>, window_params = [{transform_indices = @transform_0, window_bounds = array<i64: 128, 32>}, {pipeline_mode = #tpu.pipeline_mode<synchronous>, transform_indices = @transform_1, window_bounds = array<i64: 32, 128>}, {transform_indices = @transform_2, window_bounds = array<i64: 128, 128>}]} {
    %c0 = arith.constant 0 : index
    %c0_0 = arith.constant 0 : index
    %0 = vector.load %arg1[%c0, %c0_0] : memref<128x32xf32, #tpu.memory_space<vmem>>, vector<128x32xf32>
    %1 = tpu.iota {dimensions = array<i32: 1>} : vector<128x32xi32>
    %cst = arith.constant dense<0xFF800000> : vector<128xf32>
    %2 = vector.multi_reduction <maximumf>, %0, %cst [1] : vector<128x32xf32> to vector<128xf32>
    %3 = vector.shape_cast %2 : vector<128xf32> to vector<128x1xf32>
    %4 = vector.broadcast %3 : vector<128x1xf32> to vector<128x32xf32>
    %5 = arith.cmpf oeq, %0, %4 : vector<128x32xf32>
    %c32_i32 = arith.constant 32 : i32
    %6 = vector.broadcast %c32_i32 : i32 to vector<128x32xi32>
    %7 = arith.select %5, %1, %6 : vector<128x32xi1>, vector<128x32xi32>
    %cst_1 = arith.constant dense<2147483647> : vector<128xi32>
    %8 = vector.multi_reduction <minsi>, %7, %cst_1 [1] : vector<128x32xi32> to vector<128xi32>
    %9 = vector.shape_cast %8 : vector<128xi32> to vector<128x1xi32>
    %10 = vector.broadcast %9 : vector<128x1xi32> to vector<128x32xi32>
    %11 = arith.cmpi eq, %1, %10 : vector<128x32xi32>
    %12 = arith.extui %11 : vector<128x32xi1> to vector<128x32xi32>
    %13 = arith.sitofp %12 : vector<128x32xi32> to vector<128x32xf32>
    %c0_2 = arith.constant 0 : index
    %c0_3 = arith.constant 0 : index
    %14 = vector.load %arg2[%c0_2, %c0_3] : memref<32x128xf32, #tpu.memory_space<vmem>>, vector<32x128xf32>
    %cst_4 = arith.constant dense<0.000000e+00> : vector<128x128xf32>
    %15 = tpu.matmul %13, %14, %cst_4 {dimension_numbers = #tpu.dot_dimension_numbers<[1], [0], [0], [1], [0, 0, 1, 1], [], []>} : vector<128x32xf32>, vector<32x128xf32>, vector<128x128xf32> -> vector<128x128xf32>
    %c0_5 = arith.constant 0 : index
    %c0_6 = arith.constant 0 : index
    %16 = vector.load %arg3[%c0_5, %c0_6] : memref<128x128xf32, #tpu.memory_space<vmem>>, vector<128x128xf32>
    tpu.vector_store %arg3[%c0_5, %c0_6], %15 {strides = array<i32>} : memref<128x128xf32, #tpu.memory_space<vmem>>, vector<128x128xf32>,
    return
  }
  func.func @transform_0(%arg0: i32) -> (i32, i32) {
    %c0_i32 = arith.constant 0 : i32
    %c0_i32_0 = arith.constant 0 : i32
    return %arg0, %c0_i32 : i32, i32
  }
  func.func @transform_1(%arg0: i32) -> (i32, i32) {
    %c0_i32 = arith.constant 0 : i32
    %c0_i32_0 = arith.constant 0 : i32
    %c0_i32_1 = arith.constant 0 : i32
    return %c0_i32, %c0_i32_0 : i32, i32
  }
  func.func @transform_2(%arg0: i32) -> (i32, i32) {
    %c0_i32 = arith.constant 0 : i32
    %c0_i32_0 = arith.constant 0 : i32
    return %arg0, %c0_i32 : i32, i32
  }
}

module attributes {stable_mosaic.version = 11 : i64} {
  func.func @_onehot_dict_kernel(%arg0: i32, %arg1: memref<128x32xf32, #tpu.memory_space<vmem>>, %arg2: memref<32x128xf32, #tpu.memory_space<vmem>>, %arg3: memref<128x128xf32, #tpu.memory_space<vmem>>) attributes {dimension_semantics = [#tpu.dimension_semantics<parallel>], iteration_bounds = array<i64: 1>, scalar_prefetch = 0 : i64, scratch_operands = 0 : i64, tpu.core_type = #tpu.core_type<tc>, window_params = [{transform_indices = @transform_0, window_bounds = array<i64: 128, 32>}, {pipeline_mode = #tpu.pipeline_mode<synchronous>, transform_indices = @transform_1, window_bounds = array<i64: 32, 128>}, {transform_indices = @transform_2, window_bounds = array<i64: 128, 128>}]} {
    %c0 = arith.constant 0 : index
    %c0_0 = arith.constant 0 : index
    %0 = vector.load %arg1[%c0, %c0_0] : memref<128x32xf32, #tpu.memory_space<vmem>>, vector<128x32xf32>
    %1 = tpu.iota {dimensions = array<i32: 1>} : vector<128x32xi32>
    %cst = arith.constant dense<0xFF800000> : vector<128xf32>
    %2 = vector.multi_reduction <maximumf>, %0, %cst [1] : vector<128x32xf32> to vector<128xf32>
    %3 = vector.shape_cast %2 : vector<128xf32> to vector<128x1xf32>
    %4 = vector.broadcast %3 : vector<128x1xf32> to vector<128x32xf32>
    %5 = arith.cmpf oeq, %0, %4 : vector<128x32xf32>
    %c32_i32 = arith.constant 32 : i32
    %6 = vector.broadcast %c32_i32 : i32 to vector<128x32xi32>
    %7 = arith.select %5, %1, %6 : vector<128x32xi1>, vector<128x32xi32>
    %cst_1 = arith.constant dense<2147483647> : vector<128xi32>
    %8 = vector.multi_reduction <minsi>, %7, %cst_1 [1] : vector<128x32xi32> to vector<128xi32>
    %9 = vector.shape_cast %8 : vector<128xi32> to vector<128x1xi32>
    %10 = vector.broadcast %9 : vector<128x1xi32> to vector<128x32xi32>
    %11 = arith.cmpi eq, %1, %10 : vector<128x32xi32>
    %12 = arith.extui %11 : vector<128x32xi1> to vector<128x32xi32>
    %13 = arith.sitofp %12 : vector<128x32xi32> to vector<128x32xf32>
    %c0_2 = arith.constant 0 : index
    %c0_3 = arith.constant 0 : index
    %14 = vector.load %arg2[%c0_2, %c0_3] : memref<32x128xf32, #tpu.memory_space<vmem>>, vector<32x128xf32>
    %cst_4 = arith.constant dense<0.000000e+00> : vector<128x128xf32>
    %15 = tpu.matmul %13, %14, %cst_4 {dimension_numbers = #tpu.dot_dimension_numbers<[1], [0], [0], [1], [0, 0, 1, 1], [], []>} : vector<128x32xf32>, vector<32x128xf32>, vector<128x128xf32> -> vector<128x128xf32>
    %c0_5 = arith.constant 0 : index
    %c0_6 = arith.constant 0 : index
    %16 = vector.load %arg3[%c0_5, %c0_6] : memref<128x128xf32, #tpu.memory_space<vmem>>, vector<128x128xf32>
    tpu.vector_store %arg3[%c0_5, %c0_6], %15 {strides = array<i32>} : memref<128x128xf32, #tpu.memory_space<vmem>>, vector<128x128xf32>,
    return
  }
  func.func @transform_0(%arg0: i32) -> (i32, i32) {
    %c0_i32 = arith.constant 0 : i32
    %c0_i32_0 = arith.constant 0 : i32
    return %arg0, %c0_i32 : i32, i32
  }
  func.func @transform_1(%arg0: i32) -> (i32, i32) {
    %c0_i32 = arith.constant 0 : i32
    %c0_i32_0 = arith.constant 0 : i32
    %c0_i32_1 = arith.constant 0 : i32
    return %c0_i32, %c0_i32_0 : i32, i32
  }
  func.func @transform_2(%arg0: i32) -> (i32, i32) {
    %c0_i32 = arith.constant 0 : i32
    %c0_i32_0 = arith.constant 0 : i32
    return %arg0, %c0_i32 : i32, i32
  }
}

</mosaic_0001>

<bundles_post_ra>
// kernel: tpu_custom_call.1
= control target key start
LH: loop header
LB: loop body
LE: loop exit
PB: predicated region body
PF: predicated region fallthrough
CT: control target
= control target key end

     0   :  { %7 = vsyncpa [#allocation3], 0  ;;  %s1240_s0 = inlined_call_operand.hbm [shape: f32[128,32], index: 0, kind: input, shape index: {}]   ;;  %s1241_s1 = inlined_call_operand.hbm [shape: f32[32,128], index: 1, kind: input, shape index: {}]   ;;  %s1242_s2 = inlined_call_operand.hbm [shape: f32[128,128], index: 2, kind: output, shape index: {}]  }
   0x1   :  { %8 = vsyncpa [#allocation6], 0 }
   0x2   :  { %9 = vsyncpa [#allocation4], 0  ;;  %s832_s9 = smov [#allocation2]   ;;  %s760_s13 = scalar_lea.hbm %s1240_s0, 2048 }
   0x3   :  { %s15_s10 = sshll.u32 %s832_s9, 4  ;;  %p761_p0 = scmp.ne.s32.totalorder %s1240_s0, %s760_s13  ;;  %s16_s10 = int_to_ptr.vmem [resolvable:$true] %s15_s10 }
   0x4   :  { %p764_p1 = scmp.lt.u32.totalorder %s760_s13, %s1240_s0 }
   0x6   :  { %p766_p2 = pnand %p764_p1, %p761_p0 }
   0x8   :  { %769 = shalt.err (!%p766_p2)
}
   0x9   :  { %s770_s18 = scalar_lea.vmem %s16_s10, 2048  ;;  %p775_p4 = scmp.lt.s32.totalorder %s16_s10, %s16_s10 }
   0xa   :  { %p771_p3 = scmp.ne.s32.totalorder %s16_s10, %s770_s18  ;;  %p776_p5 = scmp.lt.s32.totalorder %s770_s18, %s770_s18 }
   0xc   :  { %p777_p6 = por %p776_p5, %p775_p4 }
   0xe   :  { %p778_p7 = pnand %p777_p6, %p771_p3 }
  0x10   :  { %781 = shalt.err (!%p778_p7)
}
  0x11   :  { %s833_s19 = smov 128   ;;  %s834_s20 = smov 8  }
  0x12   :  { %21 = dma.hbm_to_vmem [thread:$0]  %s1240_s0, 2048, %s16_s10, [#allocation3], %s833_s19, %s833_s19, %s834_s20  }
  0x13   :  { %s835_s23 = smov [#allocation5]   ;;  %s782_s27 = scalar_lea.hbm %s1241_s1, 512 }
  0x14   :  { %s27_s24 = sshll.u32 %s835_s23, 4  ;;  %p783_p8 = scmp.ne.s32.totalorder %s1241_s1, %s782_s27  ;;  %s28_s24 = int_to_ptr.vmem [resolvable:$true] %s27_s24 }
  0x15   :  { %p786_p9 = scmp.lt.u32.totalorder %s782_s27, %s1241_s1 }
  0x17   :  { %p788_p10 = pnand %p786_p9, %p783_p8 }
  0x19   :  { %791 = shalt.err (!%p788_p10)
}
  0x1a   :  { %s792_s4 = scalar_lea.vmem %s28_s24, 512  ;;  %p797_p12 = scmp.lt.s32.totalorder %s28_s24, %s28_s24 }
  0x1b   :  { %p793_p11 = scmp.ne.s32.totalorder %s28_s24, %s792_s4  ;;  %p798_p13 = scmp.lt.s32.totalorder %s792_s4, %s792_s4 }
  0x1d   :  { %p799_p0 = por %p798_p13, %p797_p12 }
  0x1f   :  { %p800_p1 = pnand %p799_p0, %p793_p11 }
  0x21   :  { %803 = shalt.err (!%p800_p1)
}
  0x22   :  { %33 = dma.hbm_to_vmem [thread:$0]  %s1241_s1, 512, %s28_s24, [#allocation6], %s833_s19, %s833_s19, %s834_s20  }
  0x23   :  { %826 = dma.done.wait [#allocation3], 2048  }
  0x24   :  { %827 = vsyncadd [#allocation3], 4294965248 }
  0x25   :  { %828 = dma.done.wait [#allocation6], 512  }
  0x26   :  { %829 = vsyncadd [#allocation6], 4294966784  ;;  %vm58_vm0 = vcmask 261120   ;;  %v40_v0 = vld [vmem:[#allocation2] sm:$0xff]  ;;  %v41_v1 = vld [vmem:[#allocation2 + $0x8] sm:$0xff]  ;;  %v56_v32 = vlaneseq  ;;  %s837_s1 = smov [#allocation7]  }
  0x27   :  { %v883_v2 = vld [vmem:[#allocation2 + $0x40] sm:$0xff]  ;;  %v59_v3 = vsel %vm58_vm0, %v40_v0, -inf  ;;  %v62_v4 = vsel %vm58_vm0, %v41_v1, -inf  ;;  %v49_v5 = vld [vmem:[#allocation2 + $0x48] sm:$0xff]  ;;  %v890_v8 = vld [vmem:[#allocation2 + $0x10] sm:$0xff]  ;;  %s645_s6 = sshll.u32 %s837_s1, 4  ;;  %s646_s6 = int_to_ptr.vmem [resolvable:$true] %s645_s6 }
  0x28   :  { %60 = vmax.xlane.f32.xlu0 %v59_v3  ;;  %63 = vmax.xlane.f32.xlu1 %v62_v4  ;;  %v83_v6 = vsel %vm58_vm0, %v883_v2, -inf  ;;  %v86_v7 = vsel %vm58_vm0, %v49_v5, -inf  ;;  %v892_v9 = vld [vmem:[#allocation2 + $0x50] sm:$0xff]  ;;  %v65_v10 = vsel %vm58_vm0, %v890_v8, -inf  ;;  %v898_v12 = vld [vmem:[#allocation2 + $0x18] sm:$0xff]  ;;  %v906_v16 = vld [vmem:[#allocation2 + $0x20] sm:$0xff]  ;;  %p809_p3 = scmp.lt.s32.totalorder %s646_s6, %s646_s6 }
  0x29   :  { %v89_v11 = vsel %vm58_vm0, %v892_v9, -inf  ;;  %v900_v13 = vld [vmem:[#allocation2 + $0x58] sm:$0xff]  ;;  %v68_v14 = vsel %vm58_vm0, %v898_v12, -inf  ;;  %v908_v17 = vld [vmem:[#allocation2 + $0x60] sm:$0xff]  ;;  %v71_v18 = vsel %vm58_vm0, %v906_v16, -inf  ;;  %v914_v20 = vld [vmem:[#allocation2 + $0x28] sm:$0xff] }
  0x2a   :  { %v92_v15 = vsel %vm58_vm0, %v900_v13, -inf  ;;  %v95_v19 = vsel %vm58_vm0, %v908_v17, -inf  ;;  %v916_v21 = vld [vmem:[#allocation2 + $0x68] sm:$0xff]  ;;  %v74_v22 = vsel %vm58_vm0, %v914_v20, -inf  ;;  %v922_v24 = vld [vmem:[#allocation2 + $0x30] sm:$0xff]  ;;  %v930_v28 = vld [vmem:[#allocation2 + $0x38] sm:$0xff] }
  0x2b   :  { %v98_v23 = vsel %vm58_vm0, %v916_v21, -inf  ;;  %v924_v25 = vld [vmem:[#allocation2 + $0x70] sm:$0xff]  ;;  %v77_v26 = vsel %vm58_vm0, %v922_v24, -inf  ;;  %v932_v29 = vld [vmem:[#allocation2 + $0x78] sm:$0xff]  ;;  %v80_v30 = vsel %vm58_vm0, %v930_v28, -inf  ;;  %v938_v33 = vand.u32 127, %v56_v32 }
  0x2c   :  { %84 = vmax.xlane.f32.xlu0 %v83_v6  ;;  %87 = vmax.xlane.f32.xlu1 %v86_v7  ;;  %v101_v27 = vsel %vm58_vm0, %v924_v25, -inf  ;;  %v104_v31 = vsel %vm58_vm0, %v932_v29, -inf  ;;  %s804_s7 = scalar_lea.vmem %s646_s6, 2048 }
  0x2d   :  { %p805_p2 = scmp.ne.s32.totalorder %s646_s6, %s804_s7  ;;  %p810_p4 = scmp.lt.s32.totalorder %s804_s7, %s804_s7 }
  0x2f   :  { %p811_p5 = por %p810_p4, %p809_p3 }
  0x30   :  { %66 = vmax.xlane.f32.xlu0 %v65_v10  ;;  %90 = vmax.xlane.f32.xlu1 %v89_v11 }
  0x31   :  { %p812_p6 = pnand %p811_p5, %p805_p2 }
  0x34   :  { %69 = vmax.xlane.f32.xlu0 %v68_v14  ;;  %93 = vmax.xlane.f32.xlu1 %v92_v15 }
  0x38   :  { %72 = vmax.xlane.f32.xlu0 %v71_v18  ;;  %96 = vmax.xlane.f32.xlu1 %v95_v19 }
  0x3c   :  { %75 = vmax.xlane.f32.xlu0 %v74_v22  ;;  %99 = vmax.xlane.f32.xlu1 %v98_v23 }
  0x40   :  { %78 = vmax.xlane.f32.xlu0 %v77_v26  ;;  %102 = vmax.xlane.f32.xlu1 %v101_v27 }
  0x44   :  { %81 = vmax.xlane.f32.xlu0 %v80_v30  ;;  %105 = vmax.xlane.f32.xlu1 %v104_v31 }
  0xb5   :  { %v61_v34 = vpop.xlane.xlu0 %60  ;;  %v64_v35 = vpop.xlane.xlu1 %63 }
  0xb6   :  { %vm107_vm1 = vcmp.eq.f32.partialorder %v40_v0, %v61_v34  ;;  %vm108_vm2 = vcmp.eq.f32.partialorder %v41_v1, %v64_v35 }
  0xb7   :  { %v123_v36 = vsel %vm107_vm1, %v938_v33, 32  ;;  %v124_v37 = vsel %vm108_vm2, %v938_v33, 32 }
  0xb8   :  { %v943_v38 = vsel %vm58_vm0, %v123_v36, 2147483647  ;;  %v946_v39 = vsel %vm58_vm0, %v124_v37, 2147483647 }
  0xb9   :  { %v85_v40 = vpop.xlane.xlu0 %84  ;;  %v88_v41 = vpop.xlane.xlu1 %87  ;;  %v141_v42 = vshra.s32 %v943_v38, 16  ;;  %v156_v43 = vshra.s32 %v946_v39, 16 }
  0xba   :  { %vm115_vm3 = vcmp.eq.f32.partialorder %v883_v2, %v85_v40  ;;  %vm116_vm4 = vcmp.eq.f32.partialorder %v49_v5, %v88_v41 }
  0xbb   :  { %v131_v44 = vsel %vm115_vm3, %v938_v33, 32  ;;  %v132_v45 = vsel %vm116_vm4, %v938_v33, 32  ;;  %v953_v46 = vcvt.s32.f32 %v141_v42  ;;  %v962_v51 = vcvt.s32.f32 %v156_v43 }
  0xbc   :  { %v956_v47 = vsel %vm58_vm0, %v131_v44, 2147483647  ;;  %v959_v48 = vsel %vm58_vm0, %v132_v45, 2147483647 }
  0xbd   :  { %144 = vmin.xlane.f32.xlu0 %v953_v46  ;;  %v67_v49 = vpop.xlane.xlu0 %66  ;;  %v91_v50 = vpop.xlane.xlu1 %90  ;;  %v261_v52 = vshra.s32 %v956_v47, 16  ;;  %v276_v53 = vshra.s32 %v959_v48, 16 }
  0xbe   :  { %vm109_vm5 = vcmp.eq.f32.partialorder %v890_v8, %v67_v49  ;;  %vm117_vm6 = vcmp.eq.f32.partialorder %v892_v9, %v91_v50 }
  0xbf   :  { %v125_v54 = vsel %vm109_vm5, %v938_v33, 32  ;;  %v133_v55 = vsel %vm117_vm6, %v938_v33, 32  ;;  %v970_v56 = vcvt.s32.f32 %v261_v52  ;;  %v980_v61 = vcvt.s32.f32 %v276_v53 }
  0xc0   :  { %v973_v57 = vsel %vm58_vm0, %v125_v54, 2147483647  ;;  %v976_v58 = vsel %vm58_vm0, %v133_v55, 2147483647 }
  0xc1   :  { %159 = vmin.xlane.f32.xlu0 %v962_v51  ;;  %264 = vmin.xlane.f32.xlu1 %v970_v56  ;;  %v70_v59 = vpop.xlane.xlu0 %69  ;;  %v94_v60 = vpop.xlane.xlu1 %93  ;;  %v171_v62 = vshra.s32 %v973_v57, 16  ;;  %v291_v63 = vshra.s32 %v976_v58, 16 }
  0xc2   :  { %vm110_vm7 = vcmp.eq.f32.partialorder %v898_v12, %v70_v59  ;;  %vm118_vm8 = vcmp.eq.f32.partialorder %v900_v13, %v94_v60  ;;  %v140_v60 = vand.u32 65535, %v943_v38  ;;  %v275_v38 = vand.u32 65535, %v959_v48 }
  0xc3   :  { %v126_v0 = vsel %vm110_vm7, %v938_v33, 32  ;;  %v134_v1 = vsel %vm118_vm8, %v938_v33, 32  ;;  %v988_v2 = vcvt.s32.f32 %v171_v62  ;;  %v998_v7 = vcvt.s32.f32 %v291_v63 }
  0xc4   :  { %v991_v3 = vsel %vm58_vm0, %v126_v0, 2147483647  ;;  %v994_v4 = vsel %vm58_vm0, %v134_v1, 2147483647  ;;  %v142_v63 = vcvt.s32.f32 %v140_v60  ;;  %v260_v0 = vand.u32 65535, %v956_v47 }
  0xc5   :  { %279 = vmin.xlane.f32.xlu1 %v980_v61  ;;  %174 = vmin.xlane.f32.xlu0 %v988_v2  ;;  %v73_v5 = vpop.xlane.xlu0 %72  ;;  %v97_v6 = vpop.xlane.xlu1 %96  ;;  %v186_v8 = vshra.s32 %v991_v3, 16  ;;  %v306_v9 = vshra.s32 %v994_v4, 16  ;;  %v155_v1 = vand.u32 65535, %v946_v39  ;;  %v290_v48 = vand.u32 65535, %v976_v58 }
  0xc6   :  { %vm111_vm9 = vcmp.eq.f32.partialorder %v906_v16, %v73_v5  ;;  %vm119_vm10 = vcmp.eq.f32.partialorder %v908_v17, %v97_v6  ;;  %v305_v58 = vand.u32 65535, %v994_v4 }
  0xc7   :  { %v127_v10 = vsel %vm111_vm9, %v938_v33, 32  ;;  %v135_v11 = vsel %vm119_vm10, %v938_v33, 32  ;;  %v1006_v12 = vcvt.s32.f32 %v186_v8  ;;  %v1016_v18 = vcvt.s32.f32 %v306_v9 }
  0xc8   :  { %v1009_v13 = vsel %vm58_vm0, %v127_v10, 2147483647  ;;  %v1012_v14 = vsel %vm58_vm0, %v135_v11, 2147483647  ;;  %v262_v9 = vcvt.s32.f32 %v260_v0  ;;  %v157_v10 = vcvt.s32.f32 %v155_v1 }
  0xc9   :  { %294 = vmin.xlane.f32.xlu1 %v998_v7  ;;  %189 = vmin.xlane.f32.xlu0 %v1006_v12  ;;  %v76_v15 = vpop.xlane.xlu0 %75  ;;  %v100_v16 = vpop.xlane.xlu1 %99  ;;  %v201_v17 = vshra.s32 %v1009_v13, 16  ;;  %v321_v19 = vshra.s32 %v1012_v14, 16  ;;  %v170_v11 = vand.u32 65535, %v973_v57  ;;  %v185_v57 = vand.u32 65535, %v991_v3 }
  0xca   :  { %vm112_vm11 = vcmp.eq.f32.partialorder %v914_v20, %v76_v15  ;;  %vm120_vm12 = vcmp.eq.f32.partialorder %v916_v21, %v100_v16  ;;  %v277_v16 = vcvt.s32.f32 %v275_v38  ;;  %v200_v3 = vand.u32 65535, %v1009_v13 }
  0xcb   :  { %v128_v22 = vsel %vm112_vm11, %v938_v33, 32  ;;  %v136_v23 = vsel %vm120_vm12, %v938_v33, 32  ;;  %v1024_v26 = vcvt.s32.f32 %v201_v17  ;;  %v1034_v32 = vcvt.s32.f32 %v321_v19 }
  0xcc   :  { %v1027_v27 = vsel %vm58_vm0, %v128_v22, 2147483647  ;;  %v1030_v30 = vsel %vm58_vm0, %v136_v23, 2147483647  ;;  %v172_v17 = vcvt.s32.f32 %v170_v11  ;;  %v292_v23 = vcvt.s32.f32 %v290_v48 }
  0xcd   :  { %309 = vmin.xlane.f32.xlu1 %v1016_v18  ;;  %204 = vmin.xlane.f32.xlu0 %v1024_v26  ;;  %v79_v31 = vpop.xlane.xlu0 %78  ;;  %v103_v20 = vpop.xlane.xlu1 %102  ;;  %v216_v21 = vshra.s32 %v1027_v27, 16  ;;  %v336_v34 = vshra.s32 %v1030_v30, 16  ;;  %v320_v4 = vand.u32 65535, %v1012_v14  ;;  %v215_v13 = vand.u32 65535, %v1027_v27 }
  0xce   :  { %vm113_vm13 = vcmp.eq.f32.partialorder %v922_v24, %v79_v31  ;;  %vm121_vm14 = vcmp.eq.f32.partialorder %v924_v25, %v103_v20  ;;  %v187_v31 = vcvt.s32.f32 %v185_v57  ;;  %v335_v27 = vand.u32 65535, %v1030_v30 }
  0xcf   :  { %v129_v35 = vsel %vm113_vm13, %v938_v33, 32  ;;  %v137_v36 = vsel %vm121_vm14, %v938_v33, 32  ;;  %v1042_v37 = vcvt.s32.f32 %v216_v21  ;;  %v1052_v43 = vcvt.s32.f32 %v336_v34 }
  0xd0   :  { %v1045_v40 = vsel %vm58_vm0, %v129_v35, 2147483647  ;;  %v1048_v41 = vsel %vm58_vm0, %v137_v36, 2147483647  ;;  %v307_v34 = vcvt.s32.f32 %v305_v58  ;;  %v202_v35 = vcvt.s32.f32 %v200_v3 }
  0xd1   :  { %324 = vmin.xlane.f32.xlu1 %v1034_v32  ;;  %219 = vmin.xlane.f32.xlu0 %v1042_v37  ;;  %v82_v42 = vpop.xlane.xlu0 %81  ;;  %v106_v24 = vpop.xlane.xlu1 %105  ;;  %v231_v25 = vshra.s32 %v1045_v40, 16  ;;  %v351_v44 = vshra.s32 %v1048_v41, 16  ;;  %v322_v14 = vcvt.s32.f32 %v320_v4 }
  0xd2   :  { %vm114_vm15 = vcmp.eq.f32.partialorder %v930_v28, %v82_v42  ;;  %vm122_vm1 = vcmp.eq.f32.partialorder %v932_v29, %v106_v24 }
  0xd3   :  { %v130_v45 = vsel %vm114_vm15, %v938_v33, 32  ;;  %v138_v49 = vsel %vm122_vm1, %v938_v33, 32  ;;  %v1060_v50 = vcvt.s32.f32 %v231_v25  ;;  %v1070_v54 = vcvt.s32.f32 %v351_v44 }
  0xd4   :  { %v1063_v52 = vsel %vm58_vm0, %v130_v45, 2147483647  ;;  %v1066_v53 = vsel %vm58_vm0, %v138_v49, 2147483647  ;;  %v217_v45 = vcvt.s32.f32 %v215_v13  ;;  %v430_v49 = vld [vmem:[#allocation5 + $0x18] sm:$0xff] }
  0xd5   :  { %339 = vmin.xlane.f32.xlu1 %v1052_v43  ;;  %234 = vmin.xlane.f32.xlu0 %v1060_v50  ;;  %v246_v28 = vshra.s32 %v1063_v52, 16  ;;  %v366_v29 = vshra.s32 %v1066_v53, 16  ;;  %v245_v1 = vand.u32 65535, %v1063_v52  ;;  %v365_v38 = vand.u32 65535, %v1066_v53 }
  0xd7   :  { %v1074_v55 = vcvt.s32.f32 %v246_v28  ;;  %v1078_v59 = vcvt.s32.f32 %v366_v29  ;;  %v247_v52 = vcvt.s32.f32 %v245_v1 }
  0xd9   :  { %354 = vmin.xlane.f32.xlu1 %v1070_v54  ;;  %249 = vmin.xlane.f32.xlu0 %v1074_v55 }
  0xdd   :  { %369 = vmin.xlane.f32.xlu1 %v1078_v59 }
 0x14a   :  { %v1082_v62 = vpop.xlane.xlu0 %144 }
 0x14b   :  { %vm146_vm2 = vcmp.eq.f32.partialorder %v953_v46, %v1082_v62  ;;  %v151_v53 = vcvt.f32.s32 %v1082_v62  ;;  %v836_v62 = vmov 0.0  }
 0x14c   :  { %v147_v5 = vsel %vm146_vm2, %v142_v63, inf  ;;  %v337_v63 = vcvt.s32.f32 %v335_v27 }
 0x14d   :  { %148 = vmin.xlane.f32.xlu0 %v147_v5 }
 0x14e   :  { %v1088_v6 = vpop.xlane.xlu1 %264  ;;  %v1090_v8 = vpop.xlane.xlu0 %159 }
 0x14f   :  { %vm266_vm3 = vcmp.eq.f32.partialorder %v970_v56, %v1088_v6  ;;  %vm161_vm4 = vcmp.eq.f32.partialorder %v962_v51, %v1090_v8 }
 0x150   :  { %v267_v39 = vsel %vm266_vm3, %v262_v9, inf  ;;  %v162_v46 = vsel %vm161_vm4, %v157_v10, inf }
 0x151   :  { %268 = vmin.xlane.f32.xlu1 %v267_v39  ;;  %163 = vmin.xlane.f32.xlu0 %v162_v46  ;;  %v367_v39 = vcvt.s32.f32 %v365_v38 }
 0x152   :  { %v1098_v47 = vpop.xlane.xlu1 %279  ;;  %v1100_v15 = vpop.xlane.xlu0 %174 }
 0x153   :  { %vm281_vm5 = vcmp.eq.f32.partialorder %v980_v61, %v1098_v47  ;;  %vm176_vm6 = vcmp.eq.f32.partialorder %v988_v2, %v1100_v15 }
 0x154   :  { %v282_v51 = vsel %vm281_vm5, %v277_v16, inf  ;;  %v177_v56 = vsel %vm176_vm6, %v172_v17, inf  ;;  %v271_v16 = vcvt.f32.s32 %v1088_v6  ;;  %v152_v17 = vshll.u32 %v151_v53, 16 }
 0x155   :  { %283 = vmin.xlane.f32.xlu1 %v282_v51  ;;  %178 = vmin.xlane.f32.xlu0 %v177_v56  ;;  %v286_v56 = vcvt.f32.s32 %v1098_v47 }
 0x156   :  { %v1108_v19 = vpop.xlane.xlu1 %294  ;;  %v1110_v22 = vpop.xlane.xlu0 %189  ;;  %v272_v51 = vshll.u32 %v271_v16, 16 }
 0x157   :  { %vm296_vm7 = vcmp.eq.f32.partialorder %v998_v7, %v1108_v19  ;;  %vm191_vm8 = vcmp.eq.f32.partialorder %v1006_v12, %v1110_v22  ;;  %v427_v7 = vld [vmem:[#allocation5] sm:$0xff]  ;;  %v428_v12 = vld [vmem:[#allocation5 + $0x8] sm:$0xff]  ;;  %v301_v47 = vcvt.f32.s32 %v1108_v19 }
 0x158   :  { %v297_v61 = vsel %vm296_vm7, %v292_v23, inf  ;;  %v192_v2 = vsel %vm191_vm8, %v187_v31, inf  ;;  %v742_v24 = vpack.c.bf16 %v428_v12, %v427_v7  ;;  %v181_v23 = vcvt.f32.s32 %v1100_v15 }
 0x159   :  { %298 = vmin.xlane.f32.xlu1 %v297_v61  ;;  %193 = vmin.xlane.f32.xlu0 %v192_v2  ;;  %v196_v15 = vcvt.f32.s32 %v1110_v22  ;;  %v302_v19 = vshll.u32 %v301_v47, 16 }
 0x15a   :  { %v1118_v20 = vpop.xlane.xlu1 %309  ;;  %v1120_v21 = vpop.xlane.xlu0 %204  ;;  %743 = vmatprep.subr.bf16.mxu0 %v742_v24  ;;  %750 = vmatprep.subr.bf16.mxu1 %v742_v24 }
 0x15b   :  { %vm311_vm9 = vcmp.eq.f32.partialorder %v1016_v18, %v1118_v20  ;;  %vm206_vm10 = vcmp.eq.f32.partialorder %v1024_v26, %v1120_v21  ;;  %v230_v18 = vand.u32 65535, %v1045_v40  ;;  %745 = vmatpush3.bf16.msra.mxu0 %v742_v24  ;;  %v429_v26 = vld [vmem:[#allocation5 + $0x10] sm:$0xff]  ;;  %752 = vmatpush3.bf16.msra.mxu1 %v742_v24  ;;  %v197_v22 = vshll.u32 %v196_v15, 16 }
 0x15c   :  { %v312_v36 = vsel %vm311_vm9, %v307_v34, inf  ;;  %v207_v42 = vsel %vm206_vm10, %v202_v35, inf  ;;  %v746_v60 = vpack.c.bf16 %v430_v49, %v429_v26  ;;  %v182_v35 = vshll.u32 %v181_v23, 16 }
 0x15d   :  { %313 = vmin.xlane.f32.xlu1 %v312_v36  ;;  %208 = vmin.xlane.f32.xlu0 %v207_v42  ;;  %v232_v0 = vcvt.s32.f32 %v230_v18  ;;  %v211_v27 = vcvt.f32.s32 %v1120_v21 }
 0x15e   :  { %v1128_v25 = vpop.xlane.xlu1 %324  ;;  %v1130_v44 = vpop.xlane.xlu0 %219  ;;  %747 = vmatprep.subr.bf16.mxu0 %v746_v60  ;;  %751 = vmatprep.subr.bf16.mxu1 %v746_v60 }
 0x15f   :  { %vm326_vm11 = vcmp.eq.f32.partialorder %v1034_v32, %v1128_v25  ;;  %vm221_vm12 = vcmp.eq.f32.partialorder %v1042_v37, %v1130_v44  ;;  %v350_v32 = vand.u32 65535, %v1048_v41  ;;  %749 = vmatpush3.bf16.msra.mxu0 %v746_v60  ;;  %753 = vmatpush3.bf16.msra.mxu1 %v746_v60  ;;  %v212_v21 = vshll.u32 %v211_v27, 16 }
 0x160   :  { %v327_v28 = vsel %vm326_vm11, %v322_v14, inf  ;;  %v222_v29 = vsel %vm221_vm12, %v217_v45, inf  ;;  %v316_v45 = vcvt.f32.s32 %v1118_v20  ;;  %v226_v1 = vcvt.f32.s32 %v1130_v44 }
 0x161   :  { %328 = vmin.xlane.f32.xlu1 %v327_v28  ;;  %223 = vmin.xlane.f32.xlu0 %v222_v29  ;;  %v352_v41 = vcvt.s32.f32 %v350_v32  ;;  %v331_v32 = vcvt.f32.s32 %v1128_v25 }
 0x162   :  { %v1138_v30 = vpop.xlane.xlu1 %339  ;;  %v1140_v40 = vpop.xlane.xlu0 %234  ;;  %v317_v20 = vshll.u32 %v316_v45, 16  ;;  %v227_v44 = vshll.u32 %v226_v1, 16 }
 0x163   :  { %vm341_vm13 = vcmp.eq.f32.partialorder %v1052_v43, %v1138_v30  ;;  %vm236_vm14 = vcmp.eq.f32.partialorder %v1060_v50, %v1140_v40  ;;  %v332_v25 = vshll.u32 %v331_v32, 16  ;;  %v241_v53 = vcvt.f32.s32 %v1140_v40 }
 0x164   :  { %v342_v37 = vsel %vm341_vm13, %v337_v63, inf  ;;  %v237_v5 = vsel %vm236_vm14, %v232_v0, inf }
 0x165   :  { %343 = vmin.xlane.f32.xlu1 %v342_v37  ;;  %238 = vmin.xlane.f32.xlu0 %v237_v5  ;;  %v242_v40 = vshll.u32 %v241_v53, 16 }
 0x166   :  { %v1148_v9 = vpop.xlane.xlu1 %354  ;;  %v1150_v10 = vpop.xlane.xlu0 %249 }
 0x167   :  { %vm356_vm15 = vcmp.eq.f32.partialorder %v1070_v54, %v1148_v9  ;;  %vm251_vm1 = vcmp.eq.f32.partialorder %v1074_v55, %v1150_v10  ;;  %v166_v55 = vcvt.f32.s32 %v1090_v8  ;;  %v287_v8 = vshll.u32 %v286_v56, 16 }
 0x168   :  { %v357_v43 = vsel %vm356_vm15, %v352_v41, inf  ;;  %v252_v50 = vsel %vm251_vm1, %v247_v52, inf  ;;  %v361_v23 = vcvt.f32.s32 %v1148_v9 }
 0x169   :  { %358 = vmin.xlane.f32.xlu1 %v357_v43  ;;  %253 = vmin.xlane.f32.xlu0 %v252_v50 }
 0x16a   :  { %v1157_v11 = vpop.xlane.xlu1 %369  ;;  %v362_v9 = vshll.u32 %v361_v23, 16 }
 0x16b   :  { %vm371_vm2 = vcmp.eq.f32.partialorder %v1078_v59, %v1157_v11  ;;  %v167_v59 = vshll.u32 %v166_v55, 16 }
 0x16c   :  { %v372_v46 = vsel %vm371_vm2, %v367_v39, inf }
 0x16d   :  { %373 = vmin.xlane.f32.xlu1 %v372_v46  ;;  %v346_v46 = vcvt.f32.s32 %v1138_v30 }
 0x16f   :  { %v347_v30 = vshll.u32 %v346_v46, 16 }
 0x1da   :  { %v149_v54 = vpop.xlane.xlu0 %148 }
 0x1db   :  { %v150_v48 = vcvt.f32.s32 %v149_v54 }
 0x1dd   :  { %v153_v57 = vadd.s32 %v152_v17, %v150_v48 }
 0x1de   :  { %v269_v31 = vpop.xlane.xlu1 %268  ;;  %v164_v58 = vpop.xlane.xlu0 %163 }
 0x1df   :  { %v270_v3 = vcvt.f32.s32 %v269_v31  ;;  %v165_v61 = vcvt.f32.s32 %v164_v58  ;;  %vm379_vm3 = vcmp.eq.s32.totalorder %v938_v33, %v153_v57  ;;  %v256_v31 = vcvt.f32.s32 %v1150_v10 }
 0x1e0   :  { %v658_v6 = vsel %vm379_vm3, 1.0, %v836_v62 }
 0x1e1   :  { %v273_v2 = vadd.s32 %v272_v51, %v270_v3  ;;  %v168_v34 = vadd.s32 %v167_v59, %v165_v61  ;;  %718 = vmatprep.mubr.msk.f32.mxu0 %vm58_vm0, %v658_v6  ;;  %v257_v10 = vshll.u32 %v256_v31, 16 }
 0x1e2   :  { %v284_v4 = vpop.xlane.xlu1 %283  ;;  %v179_v13 = vpop.xlane.xlu0 %178 }
 0x1e3   :  { %v285_v7 = vcvt.f32.s32 %v284_v4  ;;  %v180_v12 = vcvt.f32.s32 %v179_v13  ;;  %vm380_vm4 = vcmp.eq.s32.totalorder %v938_v33, %v168_v34  ;;  %vm387_vm5 = vcmp.eq.s32.totalorder %v938_v33, %v273_v2 }
 0x1e4   :  { %v659_v36 = vsel %vm380_vm4, 1.0, %v836_v62  ;;  %v666_v42 = vsel %vm387_vm5, 1.0, %v836_v62 }
 0x1e5   :  { %v288_v24 = vadd.s32 %v287_v8, %v285_v7  ;;  %v183_v14 = vadd.s32 %v182_v35, %v180_v12  ;;  %719 = vmatmul.mubr.msk.f32.vlgmr.msra.gmra.mrb[0].mxu0 %vm58_vm0, %v659_v36  ;;  %730 = vmatprep.mubr.msk.f32.mxu1 %vm58_vm0, %v666_v42  ;;  %v376_v35 = vcvt.f32.s32 %v1157_v11 }
 0x1e6   :  { %v299_v18 = vpop.xlane.xlu1 %298  ;;  %v194_v26 = vpop.xlane.xlu0 %193 }
 0x1e7   :  { %v300_v49 = vcvt.f32.s32 %v299_v18  ;;  %v195_v28 = vcvt.f32.s32 %v194_v26  ;;  %vm381_vm6 = vcmp.eq.s32.totalorder %v938_v33, %v183_v14  ;;  %vm388_vm7 = vcmp.eq.s32.totalorder %v938_v33, %v288_v24 }
 0x1e8   :  { %v660_v29 = vsel %vm381_vm6, 1.0, %v836_v62  ;;  %v667_v60 = vsel %vm388_vm7, 1.0, %v836_v62  ;;  %v377_v11 = vshll.u32 %v376_v35, 16 }
 0x1e9   :  { %v303_v63 = vadd.s32 %v302_v19, %v300_v49  ;;  %v198_v0 = vadd.s32 %v197_v22, %v195_v28  ;;  %721 = vmatprep.mubr.msk.f32.mxu0 %vm58_vm0, %v660_v29  ;;  %731 = vmatmul.mubr.msk.f32.vlgmr.msra.gmra.mrb[0].mxu1 %vm58_vm0, %v667_v60 }
 0x1ea   :  { %v314_v37 = vpop.xlane.xlu1 %313  ;;  %v209_v5 = vpop.xlane.xlu0 %208 }
 0x1eb   :  { %v315_v41 = vcvt.f32.s32 %v314_v37  ;;  %v210_v52 = vcvt.f32.s32 %v209_v5  ;;  %vm382_vm8 = vcmp.eq.s32.totalorder %v938_v33, %v198_v0  ;;  %vm389_vm9 = vcmp.eq.s32.totalorder %v938_v33, %v303_v63 }
 0x1ec   :  { %v661_v38 = vsel %vm382_vm8, 1.0, %v836_v62  ;;  %v668_v43 = vsel %vm389_vm9, 1.0, %v836_v62 }
 0x1ed   :  { %v318_v50 = vadd.s32 %v317_v20, %v315_v41  ;;  %v213_v39 = vadd.s32 %v212_v21, %v210_v52  ;;  %722 = vmatmul.mubr.msk.f32.gmra.mrb[2].mxu0 %vm58_vm0, %v661_v38  ;;  %733 = vmatprep.mubr.msk.f32.mxu1 %vm58_vm0, %v668_v43 }
 0x1ee   :  { %v329_v16 = vpop.xlane.xlu1 %328  ;;  %v224_v54 = vpop.xlane.xlu0 %223 }
 0x1ef   :  { %v330_v17 = vcvt.f32.s32 %v329_v16  ;;  %v225_v55 = vcvt.f32.s32 %v224_v54  ;;  %vm383_vm10 = vcmp.eq.s32.totalorder %v938_v33, %v213_v39  ;;  %vm390_vm11 = vcmp.eq.s32.totalorder %v938_v33, %v318_v50 }
 0x1f0   :  { %v662_v48 = vsel %vm383_vm10, 1.0, %v836_v62  ;;  %v669_v57 = vsel %vm390_vm11, 1.0, %v836_v62 }
 0x1f1   :  { %v333_v51 = vadd.s32 %v332_v25, %v330_v17  ;;  %v228_v56 = vadd.s32 %v227_v44, %v225_v55  ;;  %724 = vmatprep.mubr.msk.f32.mxu0 %vm58_vm0, %v662_v48  ;;  %734 = vmatmul.mubr.msk.f32.gmra.mrb[2].mxu1 %vm58_vm0, %v669_v57 }
 0x1f2   :  { %v344_v58 = vpop.xlane.xlu1 %343  ;;  %v239_v59 = vpop.xlane.xlu0 %238 }
 0x1f3   :  { %v345_v3 = vcvt.f32.s32 %v344_v58  ;;  %v240_v61 = vcvt.f32.s32 %v239_v59  ;;  %vm384_vm12 = vcmp.eq.s32.totalorder %v938_v33, %v228_v56  ;;  %vm391_vm13 = vcmp.eq.s32.totalorder %v938_v33, %v333_v51 }
 0x1f4   :  { %v663_v6 = vsel %vm384_vm12, 1.0, %v836_v62  ;;  %v670_v2 = vsel %vm391_vm13, 1.0, %v836_v62 }
 0x1f5   :  { %v348_v34 = vadd.s32 %v347_v30, %v345_v3  ;;  %v243_v8 = vadd.s32 %v242_v40, %v240_v61  ;;  %725 = vmatmul.mubr.msk.f32.gmra.mrb[4].mxu0 %vm58_vm0, %v663_v6  ;;  %736 = vmatprep.mubr.msk.f32.mxu1 %vm58_vm0, %v670_v2 }
 0x1f6   :  { %v359_v47 = vpop.xlane.xlu1 %358  ;;  %v254_v15 = vpop.xlane.xlu0 %253 }
 0x1f7   :  { %v360_v4 = vcvt.f32.s32 %v359_v47  ;;  %v255_v13 = vcvt.f32.s32 %v254_v15  ;;  %vm385_vm14 = vcmp.eq.s32.totalorder %v938_v33, %v243_v8  ;;  %vm392_vm15 = vcmp.eq.s32.totalorder %v938_v33, %v348_v34 }
 0x1f8   :  { %v664_v7 = vsel %vm385_vm14, 1.0, %v836_v62  ;;  %v671_v12 = vsel %vm392_vm15, 1.0, %v836_v62 }
 0x1f9   :  { %v363_v36 = vadd.s32 %v362_v9, %v360_v4  ;;  %v258_v42 = vadd.s32 %v257_v10, %v255_v13  ;;  %727 = vmatprep.mubr.msk.f32.mxu0 %vm58_vm0, %v664_v7  ;;  %737 = vmatmul.mubr.msk.f32.gmra.mrb[4].mxu1 %vm58_vm0, %v671_v12 }
 0x1fa   :  { %v374_v24 = vpop.xlane.xlu1 %373 }
 0x1fb   :  { %vm386_vm1 = vcmp.eq.s32.totalorder %v938_v33, %v258_v42  ;;  %v375_v14 = vcvt.f32.s32 %v374_v24  ;;  %vm393_vm2 = vcmp.eq.s32.totalorder %v938_v33, %v363_v36 }
 0x1fc   :  { %v665_v19 = vsel %vm386_vm1, 1.0, %v836_v62  ;;  %v672_v22 = vsel %vm393_vm2, 1.0, %v836_v62 }
 0x1fd   :  { %v378_v45 = vadd.s32 %v377_v11, %v375_v14  ;;  %728 = vmatmul.mubr.msk.f32.gmra.mrb[6].mxu0 %vm58_vm0, %v665_v19  ;;  %739 = vmatprep.mubr.msk.f32.mxu1 %vm58_vm0, %v672_v22 }
 0x1ff   :  { %vm394_vm3 = vcmp.eq.s32.totalorder %v938_v33, %v378_v45 }
 0x200   :  { %v673_v27 = vsel %vm394_vm3, 1.0, %v836_v62 }
 0x201   :  { %740 = vmatmul.mubr.msk.f32.gmra.mrb[6].mxu1 %vm58_vm0, %v673_v27 }
 0x2b8   :  { %v720_v18 = vpop.f32.mrb[0].mxu0 }
 0x2b9   :  { %625 = vst [vmem:[#allocation7 + $0x8] sm:$0xff] %v720_v18  ;;  %v545_v26 = vpop.f32.mrb[1].mxu0 }
 0x2ba   :  { %624 = vst [vmem:[#allocation7] sm:$0xff] %v545_v26 }
 0x2bc   :  { %v732_v49 = vpop.f32.mrb[0].mxu1 }
 0x2bd   :  { %633 = vst [vmem:[#allocation7 + $0x48] sm:$0xff] %v732_v49  ;;  %v585_v28 = vpop.f32.mrb[1].mxu1 }
 0x2be   :  { %632 = vst [vmem:[#allocation7 + $0x40] sm:$0xff] %v585_v28 }
 0x2c0   :  { %v723_v29 = vpop.f32.mrb[2].mxu0 }
 0x2c1   :  { %627 = vst [vmem:[#allocation7 + $0x18] sm:$0xff] %v723_v29  ;;  %v555_v60 = vpop.f32.mrb[3].mxu0 }
 0x2c2   :  { %626 = vst [vmem:[#allocation7 + $0x10] sm:$0xff] %v555_v60 }
 0x2c4   :  { %v735_v63 = vpop.f32.mrb[2].mxu1 }
 0x2c5   :  { %635 = vst [vmem:[#allocation7 + $0x58] sm:$0xff] %v735_v63  ;;  %v595_v0 = vpop.f32.mrb[3].mxu1 }
 0x2c6   :  { %634 = vst [vmem:[#allocation7 + $0x50] sm:$0xff] %v595_v0 }
 0x2c8   :  { %v726_v33 = vpop.f32.mrb[4].mxu0 }
 0x2c9   :  { %629 = vst [vmem:[#allocation7 + $0x28] sm:$0xff] %v726_v33  ;;  %v565_v62 = vpop.f32.mrb[5].mxu0 }
 0x2ca   :  { %628 = vst [vmem:[#allocation7 + $0x20] sm:$0xff] %v565_v62 }
 0x2cc   :  { %v738_v20 = vpop.f32.mrb[4].mxu1 }
 0x2cd   :  { %637 = vst [vmem:[#allocation7 + $0x68] sm:$0xff] %v738_v20  ;;  %v605_v21 = vpop.f32.mrb[5].mxu1 }
 0x2ce   :  { %636 = vst [vmem:[#allocation7 + $0x60] sm:$0xff] %v605_v21 }
 0x2d0   :  { %v729_v32 = vpop.f32.mrb[6].mxu0 }
 0x2d1   :  { %631 = vst [vmem:[#allocation7 + $0x38] sm:$0xff] %v729_v32  ;;  %v575_v1 = vpop.f32.mrb[7].mxu0 }
 0x2d2   :  { %630 = vst [vmem:[#allocation7 + $0x30] sm:$0xff] %v575_v1 }
 0x2d4   :  { %v741_v37 = vpop.f32.mrb[6].mxu1 }
 0x2d5   :  { %639 = vst [vmem:[#allocation7 + $0x78] sm:$0xff] %v741_v37  ;;  %v615_v5 = vpop.f32.mrb[7].mxu1 }
 0x2d6   :  { %638 = vst [vmem:[#allocation7 + $0x70] sm:$0xff] %v615_v5 }
 0x2d7   :  { %815 = shalt.err (!%p812_p6)
}
 0x2d8   :  { %s816_s10 = scalar_lea.hbm %s1242_s2, 2048 }
 0x2d9   :  { %p817_p7 = scmp.ne.s32.totalorder %s1242_s2, %s816_s10  ;;  %p820_p8 = scmp.lt.u32.totalorder %s816_s10, %s1242_s2 }
 0x2db   :  { %p822_p9 = pnand %p820_p8, %p817_p7 }
 0x2dd   :  { %825 = shalt.err (!%p822_p9)
}
 0x2de   :  { %651 = dma.vmem_to_hbm [thread:$0]  %s646_s6, 2048, %s1242_s2, [#allocation4], %s833_s19, %s833_s19, %s834_s20  }
 0x2df   :  { %830 = dma.done.wait [#allocation4], 2048  }
 0x2e0   :  { %831 = vsyncadd [#allocation4], 4294965248 }
 0x2e1   :  { %655 = vsyncpa [#allocation3], 1 }
 0x2e2   :  { %656 = vsyncpa [#allocation6], 1 }
 0x2e3   :  { %657 = vsyncpa [#allocation4], 1 }

// kernel: tpu_custom_call.1
= control target key start
LH: loop header
LB: loop body
LE: loop exit
PB: predicated region body
PF: predicated region fallthrough
CT: control target
= control target key end

     0   :  { %7 = vsyncpa [#allocation3], 0  ;;  %s1240_s0 = inlined_call_operand.hbm [shape: f32[128,32], index: 0, kind: input, shape index: {}]   ;;  %s1241_s1 = inlined_call_operand.hbm [shape: f32[32,128], index: 1, kind: input, shape index: {}]   ;;  %s1242_s2 = inlined_call_operand.hbm [shape: f32[128,128], index: 2, kind: output, shape index: {}]  }
   0x1   :  { %8 = vsyncpa [#allocation6], 0 }
   0x2   :  { %9 = vsyncpa [#allocation4], 0  ;;  %s832_s9 = smov [#allocation2]   ;;  %s760_s13 = scalar_lea.hbm %s1240_s0, 2048 }
   0x3   :  { %s15_s10 = sshll.u32 %s832_s9, 4  ;;  %p761_p0 = scmp.ne.s32.totalorder %s1240_s0, %s760_s13  ;;  %s16_s10 = int_to_ptr.vmem [resolvable:$true] %s15_s10 }
   0x4   :  { %p764_p1 = scmp.lt.u32.totalorder %s760_s13, %s1240_s0 }
   0x6   :  { %p766_p2 = pnand %p764_p1, %p761_p0 }
   0x8   :  { %769 = shalt.err (!%p766_p2)
}
   0x9   :  { %s770_s18 = scalar_lea.vmem %s16_s10, 2048  ;;  %p775_p4 = scmp.lt.s32.totalorder %s16_s10, %s16_s10 }
   0xa   :  { %p771_p3 = scmp.ne.s32.totalorder %s16_s10, %s770_s18  ;;  %p776_p5 = scmp.lt.s32.totalorder %s770_s18, %s770_s18 }
   0xc   :  { %p777_p6 = por %p776_p5, %p775_p4 }
   0xe   :  { %p778_p7 = pnand %p777_p6, %p771_p3 }
  0x10   :  { %781 = shalt.err (!%p778_p7)
}
  0x11   :  { %s833_s19 = smov 128   ;;  %s834_s20 = smov 8  }
  0x12   :  { %21 = dma.hbm_to_vmem [thread:$0]  %s1240_s0, 2048, %s16_s10, [#allocation3], %s833_s19, %s833_s19, %s834_s20  }
  0x13   :  { %s835_s23 = smov [#allocation5]   ;;  %s782_s27 = scalar_lea.hbm %s1241_s1, 512 }
  0x14   :  { %s27_s24 = sshll.u32 %s835_s23, 4  ;;  %p783_p8 = scmp.ne.s32.totalorder %s1241_s1, %s782_s27  ;;  %s28_s24 = int_to_ptr.vmem [resolvable:$true] %s27_s24 }
  0x15   :  { %p786_p9 = scmp.lt.u32.totalorder %s782_s27, %s1241_s1 }
  0x17   :  { %p788_p10 = pnand %p786_p9, %p783_p8 }
  0x19   :  { %791 = shalt.err (!%p788_p10)
}
  0x1a   :  { %s792_s4 = scalar_lea.vmem %s28_s24, 512  ;;  %p797_p12 = scmp.lt.s32.totalorder %s28_s24, %s28_s24 }
  0x1b   :  { %p793_p11 = scmp.ne.s32.totalorder %s28_s24, %s792_s4  ;;  %p798_p13 = scmp.lt.s32.totalorder %s792_s4, %s792_s4 }
  0x1d   :  { %p799_p0 = por %p798_p13, %p797_p12 }
  0x1f   :  { %p800_p1 = pnand %p799_p0, %p793_p11 }
  0x21   :  { %803 = shalt.err (!%p800_p1)
}
  0x22   :  { %33 = dma.hbm_to_vmem [thread:$0]  %s1241_s1, 512, %s28_s24, [#allocation6], %s833_s19, %s833_s19, %s834_s20  }
  0x23   :  { %826 = dma.done.wait [#allocation3], 2048  }
  0x24   :  { %827 = vsyncadd [#allocation3], 4294965248 }
  0x25   :  { %828 = dma.done.wait [#allocation6], 512  }
  0x26   :  { %829 = vsyncadd [#allocation6], 4294966784  ;;  %vm58_vm0 = vcmask 261120   ;;  %v40_v0 = vld [vmem:[#allocation2] sm:$0xff]  ;;  %v41_v1 = vld [vmem:[#allocation2 + $0x8] sm:$0xff]  ;;  %v56_v32 = vlaneseq  ;;  %s837_s1 = smov [#allocation7]  }
  0x27   :  { %v883_v2 = vld [vmem:[#allocation2 + $0x40] sm:$0xff]  ;;  %v59_v3 = vsel %vm58_vm0, %v40_v0, -inf  ;;  %v62_v4 = vsel %vm58_vm0, %v41_v1, -inf  ;;  %v49_v5 = vld [vmem:[#allocation2 + $0x48] sm:$0xff]  ;;  %v890_v8 = vld [vmem:[#allocation2 + $0x10] sm:$0xff]  ;;  %s645_s6 = sshll.u32 %s837_s1, 4  ;;  %s646_s6 = int_to_ptr.vmem [resolvable:$true] %s645_s6 }
  0x28   :  { %60 = vmax.xlane.f32.xlu0 %v59_v3  ;;  %63 = vmax.xlane.f32.xlu1 %v62_v4  ;;  %v83_v6 = vsel %vm58_vm0, %v883_v2, -inf  ;;  %v86_v7 = vsel %vm58_vm0, %v49_v5, -inf  ;;  %v892_v9 = vld [vmem:[#allocation2 + $0x50] sm:$0xff]  ;;  %v65_v10 = vsel %vm58_vm0, %v890_v8, -inf  ;;  %v898_v12 = vld [vmem:[#allocation2 + $0x18] sm:$0xff]  ;;  %v906_v16 = vld [vmem:[#allocation2 + $0x20] sm:$0xff]  ;;  %p809_p3 = scmp.lt.s32.totalorder %s646_s6, %s646_s6 }
  0x29   :  { %v89_v11 = vsel %vm58_vm0, %v892_v9, -inf  ;;  %v900_v13 = vld [vmem:[#allocation2 + $0x58] sm:$0xff]  ;;  %v68_v14 = vsel %vm58_vm0, %v898_v12, -inf  ;;  %v908_v17 = vld [vmem:[#allocation2 + $0x60] sm:$0xff]  ;;  %v71_v18 = vsel %vm58_vm0, %v906_v16, -inf  ;;  %v914_v20 = vld [vmem:[#allocation2 + $0x28] sm:$0xff] }
  0x2a   :  { %v92_v15 = vsel %vm58_vm0, %v900_v13, -inf  ;;  %v95_v19 = vsel %vm58_vm0, %v908_v17, -inf  ;;  %v916_v21 = vld [vmem:[#allocation2 + $0x68] sm:$0xff]  ;;  %v74_v22 = vsel %vm58_vm0, %v914_v20, -inf  ;;  %v922_v24 = vld [vmem:[#allocation2 + $0x30] sm:$0xff]  ;;  %v930_v28 = vld [vmem:[#allocation2 + $0x38] sm:$0xff] }
  0x2b   :  { %v98_v23 = vsel %vm58_vm0, %v916_v21, -inf  ;;  %v924_v25 = vld [vmem:[#allocation2 + $0x70] sm:$0xff]  ;;  %v77_v26 = vsel %vm58_vm0, %v922_v24, -inf  ;;  %v932_v29 = vld [vmem:[#allocation2 + $0x78] sm:$0xff]  ;;  %v80_v30 = vsel %vm58_vm0, %v930_v28, -inf  ;;  %v938_v33 = vand.u32 127, %v56_v32 }
  0x2c   :  { %84 = vmax.xlane.f32.xlu0 %v83_v6  ;;  %87 = vmax.xlane.f32.xlu1 %v86_v7  ;;  %v101_v27 = vsel %vm58_vm0, %v924_v25, -inf  ;;  %v104_v31 = vsel %vm58_vm0, %v932_v29, -inf  ;;  %s804_s7 = scalar_lea.vmem %s646_s6, 2048 }
  0x2d   :  { %p805_p2 = scmp.ne.s32.totalorder %s646_s6, %s804_s7  ;;  %p810_p4 = scmp.lt.s32.totalorder %s804_s7, %s804_s7 }
  0x2f   :  { %p811_p5 = por %p810_p4, %p809_p3 }
  0x30   :  { %66 = vmax.xlane.f32.xlu0 %v65_v10  ;;  %90 = vmax.xlane.f32.xlu1 %v89_v11 }
  0x31   :  { %p812_p6 = pnand %p811_p5, %p805_p2 }
  0x34   :  { %69 = vmax.xlane.f32.xlu0 %v68_v14  ;;  %93 = vmax.xlane.f32.xlu1 %v92_v15 }
  0x38   :  { %72 = vmax.xlane.f32.xlu0 %v71_v18  ;;  %96 = vmax.xlane.f32.xlu1 %v95_v19 }
  0x3c   :  { %75 = vmax.xlane.f32.xlu0 %v74_v22  ;;  %99 = vmax.xlane.f32.xlu1 %v98_v23 }
  0x40   :  { %78 = vmax.xlane.f32.xlu0 %v77_v26  ;;  %102 = vmax.xlane.f32.xlu1 %v101_v27 }
  0x44   :  { %81 = vmax.xlane.f32.xlu0 %v80_v30  ;;  %105 = vmax.xlane.f32.xlu1 %v104_v31 }
  0xb5   :  { %v61_v34 = vpop.xlane.xlu0 %60  ;;  %v64_v35 = vpop.xlane.xlu1 %63 }
  0xb6   :  { %vm107_vm1 = vcmp.eq.f32.partialorder %v40_v0, %v61_v34  ;;  %vm108_vm2 = vcmp.eq.f32.partialorder %v41_v1, %v64_v35 }
  0xb7   :  { %v123_v36 = vsel %vm107_vm1, %v938_v33, 32  ;;  %v124_v37 = vsel %vm108_vm2, %v938_v33, 32 }
  0xb8   :  { %v943_v38 = vsel %vm58_vm0, %v123_v36, 2147483647  ;;  %v946_v39 = vsel %vm58_vm0, %v124_v37, 2147483647 }
  0xb9   :  { %v85_v40 = vpop.xlane.xlu0 %84  ;;  %v88_v41 = vpop.xlane.xlu1 %87  ;;  %v141_v42 = vshra.s32 %v943_v38, 16  ;;  %v156_v43 = vshra.s32 %v946_v39, 16 }
  0xba   :  { %vm115_vm3 = vcmp.eq.f32.partialorder %v883_v2, %v85_v40  ;;  %vm116_vm4 = vcmp.eq.f32.partialorder %v49_v5, %v88_v41 }
  0xbb   :  { %v131_v44 = vsel %vm115_vm3, %v938_v33, 32  ;;  %v132_v45 = vsel %vm116_vm4, %v938_v33, 32  ;;  %v953_v46 = vcvt.s32.f32 %v141_v42  ;;  %v962_v51 = vcvt.s32.f32 %v156_v43 }
  0xbc   :  { %v956_v47 = vsel %vm58_vm0, %v131_v44, 2147483647  ;;  %v959_v48 = vsel %vm58_vm0, %v132_v45, 2147483647 }
  0xbd   :  { %144 = vmin.xlane.f32.xlu0 %v953_v46  ;;  %v67_v49 = vpop.xlane.xlu0 %66  ;;  %v91_v50 = vpop.xlane.xlu1 %90  ;;  %v261_v52 = vshra.s32 %v956_v47, 16  ;;  %v276_v53 = vshra.s32 %v959_v48, 16 }
  0xbe   :  { %vm109_vm5 = vcmp.eq.f32.partialorder %v890_v8, %v67_v49  ;;  %vm117_vm6 = vcmp.eq.f32.partialorder %v892_v9, %v91_v50 }
  0xbf   :  { %v125_v54 = vsel %vm109_vm5, %v938_v33, 32  ;;  %v133_v55 = vsel %vm117_vm6, %v938_v33, 32  ;;  %v970_v56 = vcvt.s32.f32 %v261_v52  ;;  %v980_v61 = vcvt.s32.f32 %v276_v53 }
  0xc0   :  { %v973_v57 = vsel %vm58_vm0, %v125_v54, 2147483647  ;;  %v976_v58 = vsel %vm58_vm0, %v133_v55, 2147483647 }
  0xc1   :  { %159 = vmin.xlane.f32.xlu0 %v962_v51  ;;  %264 = vmin.xlane.f32.xlu1 %v970_v56  ;;  %v70_v59 = vpop.xlane.xlu0 %69  ;;  %v94_v60 = vpop.xlane.xlu1 %93  ;;  %v171_v62 = vshra.s32 %v973_v57, 16  ;;  %v291_v63 = vshra.s32 %v976_v58, 16 }
  0xc2   :  { %vm110_vm7 = vcmp.eq.f32.partialorder %v898_v12, %v70_v59  ;;  %vm118_vm8 = vcmp.eq.f32.partialorder %v900_v13, %v94_v60  ;;  %v140_v60 = vand.u32 65535, %v943_v38  ;;  %v275_v38 = vand.u32 65535, %v959_v48 }
  0xc3   :  { %v126_v0 = vsel %vm110_vm7, %v938_v33, 32  ;;  %v134_v1 = vsel %vm118_vm8, %v938_v33, 32  ;;  %v988_v2 = vcvt.s32.f32 %v171_v62  ;;  %v998_v7 = vcvt.s32.f32 %v291_v63 }
  0xc4   :  { %v991_v3 = vsel %vm58_vm0, %v126_v0, 2147483647  ;;  %v994_v4 = vsel %vm58_vm0, %v134_v1, 2147483647  ;;  %v142_v63 = vcvt.s32.f32 %v140_v60  ;;  %v260_v0 = vand.u32 65535, %v956_v47 }
  0xc5   :  { %279 = vmin.xlane.f32.xlu1 %v980_v61  ;;  %174 = vmin.xlane.f32.xlu0 %v988_v2  ;;  %v73_v5 = vpop.xlane.xlu0 %72  ;;  %v97_v6 = vpop.xlane.xlu1 %96  ;;  %v186_v8 = vshra.s32 %v991_v3, 16  ;;  %v306_v9 = vshra.s32 %v994_v4, 16  ;;  %v155_v1 = vand.u32 65535, %v946_v39  ;;  %v290_v48 = vand.u32 65535, %v976_v58 }
  0xc6   :  { %vm111_vm9 = vcmp.eq.f32.partialorder %v906_v16, %v73_v5  ;;  %vm119_vm10 = vcmp.eq.f32.partialorder %v908_v17, %v97_v6  ;;  %v305_v58 = vand.u32 65535, %v994_v4 }
  0xc7   :  { %v127_v10 = vsel %vm111_vm9, %v938_v33, 32  ;;  %v135_v11 = vsel %vm119_vm10, %v938_v33, 32  ;;  %v1006_v12 = vcvt.s32.f32 %v186_v8  ;;  %v1016_v18 = vcvt.s32.f32 %v306_v9 }
  0xc8   :  { %v1009_v13 = vsel %vm58_vm0, %v127_v10, 2147483647  ;;  %v1012_v14 = vsel %vm58_vm0, %v135_v11, 2147483647  ;;  %v262_v9 = vcvt.s32.f32 %v260_v0  ;;  %v157_v10 = vcvt.s32.f32 %v155_v1 }
  0xc9   :  { %294 = vmin.xlane.f32.xlu1 %v998_v7  ;;  %189 = vmin.xlane.f32.xlu0 %v1006_v12  ;;  %v76_v15 = vpop.xlane.xlu0 %75  ;;  %v100_v16 = vpop.xlane.xlu1 %99  ;;  %v201_v17 = vshra.s32 %v1009_v13, 16  ;;  %v321_v19 = vshra.s32 %v1012_v14, 16  ;;  %v170_v11 = vand.u32 65535, %v973_v57  ;;  %v185_v57 = vand.u32 65535, %v991_v3 }
  0xca   :  { %vm112_vm11 = vcmp.eq.f32.partialorder %v914_v20, %v76_v15  ;;  %vm120_vm12 = vcmp.eq.f32.partialorder %v916_v21, %v100_v16  ;;  %v277_v16 = vcvt.s32.f32 %v275_v38  ;;  %v200_v3 = vand.u32 65535, %v1009_v13 }
  0xcb   :  { %v128_v22 = vsel %vm112_vm11, %v938_v33, 32  ;;  %v136_v23 = vsel %vm120_vm12, %v938_v33, 32  ;;  %v1024_v26 = vcvt.s32.f32 %v201_v17  ;;  %v1034_v32 = vcvt.s32.f32 %v321_v19 }
  0xcc   :  { %v1027_v27 = vsel %vm58_vm0, %v128_v22, 2147483647  ;;  %v1030_v30 = vsel %vm58_vm0, %v136_v23, 2147483647  ;;  %v172_v17 = vcvt.s32.f32 %v170_v11  ;;  %v292_v23 = vcvt.s32.f32 %v290_v48 }
  0xcd   :  { %309 = vmin.xlane.f32.xlu1 %v1016_v18  ;;  %204 = vmin.xlane.f32.xlu0 %v1024_v26  ;;  %v79_v31 = vpop.xlane.xlu0 %78  ;;  %v103_v20 = vpop.xlane.xlu1 %102  ;;  %v216_v21 = vshra.s32 %v1027_v27, 16  ;;  %v336_v34 = vshra.s32 %v1030_v30, 16  ;;  %v320_v4 = vand.u32 65535, %v1012_v14  ;;  %v215_v13 = vand.u32 65535, %v1027_v27 }
  0xce   :  { %vm113_vm13 = vcmp.eq.f32.partialorder %v922_v24, %v79_v31  ;;  %vm121_vm14 = vcmp.eq.f32.partialorder %v924_v25, %v103_v20  ;;  %v187_v31 = vcvt.s32.f32 %v185_v57  ;;  %v335_v27 = vand.u32 65535, %v1030_v30 }
  0xcf   :  { %v129_v35 = vsel %vm113_vm13, %v938_v33, 32  ;;  %v137_v36 = vsel %vm121_vm14, %v938_v33, 32  ;;  %v1042_v37 = vcvt.s32.f32 %v216_v21  ;;  %v1052_v43 = vcvt.s32.f32 %v336_v34 }
  0xd0   :  { %v1045_v40 = vsel %vm58_vm0, %v129_v35, 2147483647  ;;  %v1048_v41 = vsel %vm58_vm0, %v137_v36, 2147483647  ;;  %v307_v34 = vcvt.s32.f32 %v305_v58  ;;  %v202_v35 = vcvt.s32.f32 %v200_v3 }
  0xd1   :  { %324 = vmin.xlane.f32.xlu1 %v1034_v32  ;;  %219 = vmin.xlane.f32.xlu0 %v1042_v37  ;;  %v82_v42 = vpop.xlane.xlu0 %81  ;;  %v106_v24 = vpop.xlane.xlu1 %105  ;;  %v231_v25 = vshra.s32 %v1045_v40, 16  ;;  %v351_v44 = vshra.s32 %v1048_v41, 16  ;;  %v322_v14 = vcvt.s32.f32 %v320_v4 }
  0xd2   :  { %vm114_vm15 = vcmp.eq.f32.partialorder %v930_v28, %v82_v42  ;;  %vm122_vm1 = vcmp.eq.f32.partialorder %v932_v29, %v106_v24 }
  0xd3   :  { %v130_v45 = vsel %vm114_vm15, %v938_v33, 32  ;;  %v138_v49 = vsel %vm122_vm1, %v938_v33, 32  ;;  %v1060_v50 = vcvt.s32.f32 %v231_v25  ;;  %v1070_v54 = vcvt.s32.f32 %v351_v44 }
  0xd4   :  { %v1063_v52 = vsel %vm58_vm0, %v130_v45, 2147483647  ;;  %v1066_v53 = vsel %vm58_vm0, %v138_v49, 2147483647  ;;  %v217_v45 = vcvt.s32.f32 %v215_v13  ;;  %v430_v49 = vld [vmem:[#allocation5 + $0x18] sm:$0xff] }
  0xd5   :  { %339 = vmin.xlane.f32.xlu1 %v1052_v43  ;;  %234 = vmin.xlane.f32.xlu0 %v1060_v50  ;;  %v246_v28 = vshra.s32 %v1063_v52, 16  ;;  %v366_v29 = vshra.s32 %v1066_v53, 16  ;;  %v245_v1 = vand.u32 65535, %v1063_v52  ;;  %v365_v38 = vand.u32 65535, %v1066_v53 }
  0xd7   :  { %v1074_v55 = vcvt.s32.f32 %v246_v28  ;;  %v1078_v59 = vcvt.s32.f32 %v366_v29  ;;  %v247_v52 = vcvt.s32.f32 %v245_v1 }
  0xd9   :  { %354 = vmin.xlane.f32.xlu1 %v1070_v54  ;;  %249 = vmin.xlane.f32.xlu0 %v1074_v55 }
  0xdd   :  { %369 = vmin.xlane.f32.xlu1 %v1078_v59 }
 0x14a   :  { %v1082_v62 = vpop.xlane.xlu0 %144 }
 0x14b   :  { %vm146_vm2 = vcmp.eq.f32.partialorder %v953_v46, %v1082_v62  ;;  %v151_v53 = vcvt.f32.s32 %v1082_v62  ;;  %v836_v62 = vmov 0.0  }
 0x14c   :  { %v147_v5 = vsel %vm146_vm2, %v142_v63, inf  ;;  %v337_v63 = vcvt.s32.f32 %v335_v27 }
 0x14d   :  { %148 = vmin.xlane.f32.xlu0 %v147_v5 }
 0x14e   :  { %v1088_v6 = vpop.xlane.xlu1 %264  ;;  %v1090_v8 = vpop.xlane.xlu0 %159 }
 0x14f   :  { %vm266_vm3 = vcmp.eq.f32.partialorder %v970_v56, %v1088_v6  ;;  %vm161_vm4 = vcmp.eq.f32.partialorder %v962_v51, %v1090_v8 }
 0x150   :  { %v267_v39 = vsel %vm266_vm3, %v262_v9, inf  ;;  %v162_v46 = vsel %vm161_vm4, %v157_v10, inf }
 0x151   :  { %268 = vmin.xlane.f32.xlu1 %v267_v39  ;;  %163 = vmin.xlane.f32.xlu0 %v162_v46  ;;  %v367_v39 = vcvt.s32.f32 %v365_v38 }
 0x152   :  { %v1098_v47 = vpop.xlane.xlu1 %279  ;;  %v1100_v15 = vpop.xlane.xlu0 %174 }
 0x153   :  { %vm281_vm5 = vcmp.eq.f32.partialorder %v980_v61, %v1098_v47  ;;  %vm176_vm6 = vcmp.eq.f32.partialorder %v988_v2, %v1100_v15 }
 0x154   :  { %v282_v51 = vsel %vm281_vm5, %v277_v16, inf  ;;  %v177_v56 = vsel %vm176_vm6, %v172_v17, inf  ;;  %v271_v16 = vcvt.f32.s32 %v1088_v6  ;;  %v152_v17 = vshll.u32 %v151_v53, 16 }
 0x155   :  { %283 = vmin.xlane.f32.xlu1 %v282_v51  ;;  %178 = vmin.xlane.f32.xlu0 %v177_v56  ;;  %v286_v56 = vcvt.f32.s32 %v1098_v47 }
 0x156   :  { %v1108_v19 = vpop.xlane.xlu1 %294  ;;  %v1110_v22 = vpop.xlane.xlu0 %189  ;;  %v272_v51 = vshll.u32 %v271_v16, 16 }
 0x157   :  { %vm296_vm7 = vcmp.eq.f32.partialorder %v998_v7, %v1108_v19  ;;  %vm191_vm8 = vcmp.eq.f32.partialorder %v1006_v12, %v1110_v22  ;;  %v427_v7 = vld [vmem:[#allocation5] sm:$0xff]  ;;  %v428_v12 = vld [vmem:[#allocation5 + $0x8] sm:$0xff]  ;;  %v301_v47 = vcvt.f32.s32 %v1108_v19 }
 0x158   :  { %v297_v61 = vsel %vm296_vm7, %v292_v23, inf  ;;  %v192_v2 = vsel %vm191_vm8, %v187_v31, inf  ;;  %v742_v24 = vpack.c.bf16 %v428_v12, %v427_v7  ;;  %v181_v23 = vcvt.f32.s32 %v1100_v15 }
 0x159   :  { %298 = vmin.xlane.f32.xlu1 %v297_v61  ;;  %193 = vmin.xlane.f32.xlu0 %v192_v2  ;;  %v196_v15 = vcvt.f32.s32 %v1110_v22  ;;  %v302_v19 = vshll.u32 %v301_v47, 16 }
 0x15a   :  { %v1118_v20 = vpop.xlane.xlu1 %309  ;;  %v1120_v21 = vpop.xlane.xlu0 %204  ;;  %743 = vmatprep.subr.bf16.mxu0 %v742_v24  ;;  %750 = vmatprep.subr.bf16.mxu1 %v742_v24 }
 0x15b   :  { %vm311_vm9 = vcmp.eq.f32.partialorder %v1016_v18, %v1118_v20  ;;  %vm206_vm10 = vcmp.eq.f32.partialorder %v1024_v26, %v1120_v21  ;;  %v230_v18 = vand.u32 65535, %v1045_v40  ;;  %745 = vmatpush3.bf16.msra.mxu0 %v742_v24  ;;  %v429_v26 = vld [vmem:[#allocation5 + $0x10] sm:$0xff]  ;;  %752 = vmatpush3.bf16.msra.mxu1 %v742_v24  ;;  %v197_v22 = vshll.u32 %v196_v15, 16 }
 0x15c   :  { %v312_v36 = vsel %vm311_vm9, %v307_v34, inf  ;;  %v207_v42 = vsel %vm206_vm10, %v202_v35, inf  ;;  %v746_v60 = vpack.c.bf16 %v430_v49, %v429_v26  ;;  %v182_v35 = vshll.u32 %v181_v23, 16 }
 0x15d   :  { %313 = vmin.xlane.f32.xlu1 %v312_v36  ;;  %208 = vmin.xlane.f32.xlu0 %v207_v42  ;;  %v232_v0 = vcvt.s32.f32 %v230_v18  ;;  %v211_v27 = vcvt.f32.s32 %v1120_v21 }
 0x15e   :  { %v1128_v25 = vpop.xlane.xlu1 %324  ;;  %v1130_v44 = vpop.xlane.xlu0 %219  ;;  %747 = vmatprep.subr.bf16.mxu0 %v746_v60  ;;  %751 = vmatprep.subr.bf16.mxu1 %v746_v60 }
 0x15f   :  { %vm326_vm11 = vcmp.eq.f32.partialorder %v1034_v32, %v1128_v25  ;;  %vm221_vm12 = vcmp.eq.f32.partialorder %v1042_v37, %v1130_v44  ;;  %v350_v32 = vand.u32 65535, %v1048_v41  ;;  %749 = vmatpush3.bf16.msra.mxu0 %v746_v60  ;;  %753 = vmatpush3.bf16.msra.mxu1 %v746_v60  ;;  %v212_v21 = vshll.u32 %v211_v27, 16 }
 0x160   :  { %v327_v28 = vsel %vm326_vm11, %v322_v14, inf  ;;  %v222_v29 = vsel %vm221_vm12, %v217_v45, inf  ;;  %v316_v45 = vcvt.f32.s32 %v1118_v20  ;;  %v226_v1 = vcvt.f32.s32 %v1130_v44 }
 0x161   :  { %328 = vmin.xlane.f32.xlu1 %v327_v28  ;;  %223 = vmin.xlane.f32.xlu0 %v222_v29  ;;  %v352_v41 = vcvt.s32.f32 %v350_v32  ;;  %v331_v32 = vcvt.f32.s32 %v1128_v25 }
 0x162   :  { %v1138_v30 = vpop.xlane.xlu1 %339  ;;  %v1140_v40 = vpop.xlane.xlu0 %234  ;;  %v317_v20 = vshll.u32 %v316_v45, 16  ;;  %v227_v44 = vshll.u32 %v226_v1, 16 }
 0x163   :  { %vm341_vm13 = vcmp.eq.f32.partialorder %v1052_v43, %v1138_v30  ;;  %vm236_vm14 = vcmp.eq.f32.partialorder %v1060_v50, %v1140_v40  ;;  %v332_v25 = vshll.u32 %v331_v32, 16  ;;  %v241_v53 = vcvt.f32.s32 %v1140_v40 }
 0x164   :  { %v342_v37 = vsel %vm341_vm13, %v337_v63, inf  ;;  %v237_v5 = vsel %vm236_vm14, %v232_v0, inf }
 0x165   :  { %343 = vmin.xlane.f32.xlu1 %v342_v37  ;;  %238 = vmin.xlane.f32.xlu0 %v237_v5  ;;  %v242_v40 = vshll.u32 %v241_v53, 16 }
 0x166   :  { %v1148_v9 = vpop.xlane.xlu1 %354  ;;  %v1150_v10 = vpop.xlane.xlu0 %249 }
 0x167   :  { %vm356_vm15 = vcmp.eq.f32.partialorder %v1070_v54, %v1148_v9  ;;  %vm251_vm1 = vcmp.eq.f32.partialorder %v1074_v55, %v1150_v10  ;;  %v166_v55 = vcvt.f32.s32 %v1090_v8  ;;  %v287_v8 = vshll.u32 %v286_v56, 16 }
 0x168   :  { %v357_v43 = vsel %vm356_vm15, %v352_v41, inf  ;;  %v252_v50 = vsel %vm251_vm1, %v247_v52, inf  ;;  %v361_v23 = vcvt.f32.s32 %v1148_v9 }
 0x169   :  { %358 = vmin.xlane.f32.xlu1 %v357_v43  ;;  %253 = vmin.xlane.f32.xlu0 %v252_v50 }
 0x16a   :  { %v1157_v11 = vpop.xlane.xlu1 %369  ;;  %v362_v9 = vshll.u32 %v361_v23, 16 }
 0x16b   :  { %vm371_vm2 = vcmp.eq.f32.partialorder %v1078_v59, %v1157_v11  ;;  %v167_v59 = vshll.u32 %v166_v55, 16 }
 0x16c   :  { %v372_v46 = vsel %vm371_vm2, %v367_v39, inf }
 0x16d   :  { %373 = vmin.xlane.f32.xlu1 %v372_v46  ;;  %v346_v46 = vcvt.f32.s32 %v1138_v30 }
 0x16f   :  { %v347_v30 = vshll.u32 %v346_v46, 16 }
 0x1da   :  { %v149_v54 = vpop.xlane.xlu0 %148 }
 0x1db   :  { %v150_v48 = vcvt.f32.s32 %v149_v54 }
 0x1dd   :  { %v153_v57 = vadd.s32 %v152_v17, %v150_v48 }
 0x1de   :  { %v269_v31 = vpop.xlane.xlu1 %268  ;;  %v164_v58 = vpop.xlane.xlu0 %163 }
 0x1df   :  { %v270_v3 = vcvt.f32.s32 %v269_v31  ;;  %v165_v61 = vcvt.f32.s32 %v164_v58  ;;  %vm379_vm3 = vcmp.eq.s32.totalorder %v938_v33, %v153_v57  ;;  %v256_v31 = vcvt.f32.s32 %v1150_v10 }
 0x1e0   :  { %v658_v6 = vsel %vm379_vm3, 1.0, %v836_v62 }
 0x1e1   :  { %v273_v2 = vadd.s32 %v272_v51, %v270_v3  ;;  %v168_v34 = vadd.s32 %v167_v59, %v165_v61  ;;  %718 = vmatprep.mubr.msk.f32.mxu0 %vm58_vm0, %v658_v6  ;;  %v257_v10 = vshll.u32 %v256_v31, 16 }
 0x1e2   :  { %v284_v4 = vpop.xlane.xlu1 %283  ;;  %v179_v13 = vpop.xlane.xlu0 %178 }
 0x1e3   :  { %v285_v7 = vcvt.f32.s32 %v284_v4  ;;  %v180_v12 = vcvt.f32.s32 %v179_v13  ;;  %vm380_vm4 = vcmp.eq.s32.totalorder %v938_v33, %v168_v34  ;;  %vm387_vm5 = vcmp.eq.s32.totalorder %v938_v33, %v273_v2 }
 0x1e4   :  { %v659_v36 = vsel %vm380_vm4, 1.0, %v836_v62  ;;  %v666_v42 = vsel %vm387_vm5, 1.0, %v836_v62 }
 0x1e5   :  { %v288_v24 = vadd.s32 %v287_v8, %v285_v7  ;;  %v183_v14 = vadd.s32 %v182_v35, %v180_v12  ;;  %719 = vmatmul.mubr.msk.f32.vlgmr.msra.gmra.mrb[0].mxu0 %vm58_vm0, %v659_v36  ;;  %730 = vmatprep.mubr.msk.f32.mxu1 %vm58_vm0, %v666_v42  ;;  %v376_v35 = vcvt.f32.s32 %v1157_v11 }
 0x1e6   :  { %v299_v18 = vpop.xlane.xlu1 %298  ;;  %v194_v26 = vpop.xlane.xlu0 %193 }
 0x1e7   :  { %v300_v49 = vcvt.f32.s32 %v299_v18  ;;  %v195_v28 = vcvt.f32.s32 %v194_v26  ;;  %vm381_vm6 = vcmp.eq.s32.totalorder %v938_v33, %v183_v14  ;;  %vm388_vm7 = vcmp.eq.s32.totalorder %v938_v33, %v288_v24 }
 0x1e8   :  { %v660_v29 = vsel %vm381_vm6, 1.0, %v836_v62  ;;  %v667_v60 = vsel %vm388_vm7, 1.0, %v836_v62  ;;  %v377_v11 = vshll.u32 %v376_v35, 16 }
 0x1e9   :  { %v303_v63 = vadd.s32 %v302_v19, %v300_v49  ;;  %v198_v0 = vadd.s32 %v197_v22, %v195_v28  ;;  %721 = vmatprep.mubr.msk.f32.mxu0 %vm58_vm0, %v660_v29  ;;  %731 = vmatmul.mubr.msk.f32.vlgmr.msra.gmra.mrb[0].mxu1 %vm58_vm0, %v667_v60 }
 0x1ea   :  { %v314_v37 = vpop.xlane.xlu1 %313  ;;  %v209_v5 = vpop.xlane.xlu0 %208 }
 0x1eb   :  { %v315_v41 = vcvt.f32.s32 %v314_v37  ;;  %v210_v52 = vcvt.f32.s32 %v209_v5  ;;  %vm382_vm8 = vcmp.eq.s32.totalorder %v938_v33, %v198_v0  ;;  %vm389_vm9 = vcmp.eq.s32.totalorder %v938_v33, %v303_v63 }
 0x1ec   :  { %v661_v38 = vsel %vm382_vm8, 1.0, %v836_v62  ;;  %v668_v43 = vsel %vm389_vm9, 1.0, %v836_v62 }
 0x1ed   :  { %v318_v50 = vadd.s32 %v317_v20, %v315_v41  ;;  %v213_v39 = vadd.s32 %v212_v21, %v210_v52  ;;  %722 = vmatmul.mubr.msk.f32.gmra.mrb[2].mxu0 %vm58_vm0, %v661_v38  ;;  %733 = vmatprep.mubr.msk.f32.mxu1 %vm58_vm0, %v668_v43 }
 0x1ee   :  { %v329_v16 = vpop.xlane.xlu1 %328  ;;  %v224_v54 = vpop.xlane.xlu0 %223 }
 0x1ef   :  { %v330_v17 = vcvt.f32.s32 %v329_v16  ;;  %v225_v55 = vcvt.f32.s32 %v224_v54  ;;  %vm383_vm10 = vcmp.eq.s32.totalorder %v938_v33, %v213_v39  ;;  %vm390_vm11 = vcmp.eq.s32.totalorder %v938_v33, %v318_v50 }
 0x1f0   :  { %v662_v48 = vsel %vm383_vm10, 1.0, %v836_v62  ;;  %v669_v57 = vsel %vm390_vm11, 1.0, %v836_v62 }
 0x1f1   :  { %v333_v51 = vadd.s32 %v332_v25, %v330_v17  ;;  %v228_v56 = vadd.s32 %v227_v44, %v225_v55  ;;  %724 = vmatprep.mubr.msk.f32.mxu0 %vm58_vm0, %v662_v48  ;;  %734 = vmatmul.mubr.msk.f32.gmra.mrb[2].mxu1 %vm58_vm0, %v669_v57 }
 0x1f2   :  { %v344_v58 = vpop.xlane.xlu1 %343  ;;  %v239_v59 = vpop.xlane.xlu0 %238 }
 0x1f3   :  { %v345_v3 = vcvt.f32.s32 %v344_v58  ;;  %v240_v61 = vcvt.f32.s32 %v239_v59  ;;  %vm384_vm12 = vcmp.eq.s32.totalorder %v938_v33, %v228_v56  ;;  %vm391_vm13 = vcmp.eq.s32.totalorder %v938_v33, %v333_v51 }
 0x1f4   :  { %v663_v6 = vsel %vm384_vm12, 1.0, %v836_v62  ;;  %v670_v2 = vsel %vm391_vm13, 1.0, %v836_v62 }
 0x1f5   :  { %v348_v34 = vadd.s32 %v347_v30, %v345_v3  ;;  %v243_v8 = vadd.s32 %v242_v40, %v240_v61  ;;  %725 = vmatmul.mubr.msk.f32.gmra.mrb[4].mxu0 %vm58_vm0, %v663_v6  ;;  %736 = vmatprep.mubr.msk.f32.mxu1 %vm58_vm0, %v670_v2 }
 0x1f6   :  { %v359_v47 = vpop.xlane.xlu1 %358  ;;  %v254_v15 = vpop.xlane.xlu0 %253 }
 0x1f7   :  { %v360_v4 = vcvt.f32.s32 %v359_v47  ;;  %v255_v13 = vcvt.f32.s32 %v254_v15  ;;  %vm385_vm14 = vcmp.eq.s32.totalorder %v938_v33, %v243_v8  ;;  %vm392_vm15 = vcmp.eq.s32.totalorder %v938_v33, %v348_v34 }
 0x1f8   :  { %v664_v7 = vsel %vm385_vm14, 1.0, %v836_v62  ;;  %v671_v12 = vsel %vm392_vm15, 1.0, %v836_v62 }
 0x1f9   :  { %v363_v36 = vadd.s32 %v362_v9, %v360_v4  ;;  %v258_v42 = vadd.s32 %v257_v10, %v255_v13  ;;  %727 = vmatprep.mubr.msk.f32.mxu0 %vm58_vm0, %v664_v7  ;;  %737 = vmatmul.mubr.msk.f32.gmra.mrb[4].mxu1 %vm58_vm0, %v671_v12 }
 0x1fa   :  { %v374_v24 = vpop.xlane.xlu1 %373 }
 0x1fb   :  { %vm386_vm1 = vcmp.eq.s32.totalorder %v938_v33, %v258_v42  ;;  %v375_v14 = vcvt.f32.s32 %v374_v24  ;;  %vm393_vm2 = vcmp.eq.s32.totalorder %v938_v33, %v363_v36 }
 0x1fc   :  { %v665_v19 = vsel %vm386_vm1, 1.0, %v836_v62  ;;  %v672_v22 = vsel %vm393_vm2, 1.0, %v836_v62 }
 0x1fd   :  { %v378_v45 = vadd.s32 %v377_v11, %v375_v14  ;;  %728 = vmatmul.mubr.msk.f32.gmra.mrb[6].mxu0 %vm58_vm0, %v665_v19  ;;  %739 = vmatprep.mubr.msk.f32.mxu1 %vm58_vm0, %v672_v22 }
 0x1ff   :  { %vm394_vm3 = vcmp.eq.s32.totalorder %v938_v33, %v378_v45 }
 0x200   :  { %v673_v27 = vsel %vm394_vm3, 1.0, %v836_v62 }
 0x201   :  { %740 = vmatmul.mubr.msk.f32.gmra.mrb[6].mxu1 %vm58_vm0, %v673_v27 }
 0x2b8   :  { %v720_v18 = vpop.f32.mrb[0].mxu0 }
 0x2b9   :  { %625 = vst [vmem:[#allocation7 + $0x8] sm:$0xff] %v720_v18  ;;  %v545_v26 = vpop.f32.mrb[1].mxu0 }
 0x2ba   :  { %624 = vst [vmem:[#allocation7] sm:$0xff] %v545_v26 }
 0x2bc   :  { %v732_v49 = vpop.f32.mrb[0].mxu1 }
 0x2bd   :  { %633 = vst [vmem:[#allocation7 + $0x48] sm:$0xff] %v732_v49  ;;  %v585_v28 = vpop.f32.mrb[1].mxu1 }
 0x2be   :  { %632 = vst [vmem:[#allocation7 + $0x40] sm:$0xff] %v585_v28 }
 0x2c0   :  { %v723_v29 = vpop.f32.mrb[2].mxu0 }
 0x2c1   :  { %627 = vst [vmem:[#allocation7 + $0x18] sm:$0xff] %v723_v29  ;;  %v555_v60 = vpop.f32.mrb[3].mxu0 }
 0x2c2   :  { %626 = vst [vmem:[#allocation7 + $0x10] sm:$0xff] %v555_v60 }
 0x2c4   :  { %v735_v63 = vpop.f32.mrb[2].mxu1 }
 0x2c5   :  { %635 = vst [vmem:[#allocation7 + $0x58] sm:$0xff] %v735_v63  ;;  %v595_v0 = vpop.f32.mrb[3].mxu1 }
 0x2c6   :  { %634 = vst [vmem:[#allocation7 + $0x50] sm:$0xff] %v595_v0 }
 0x2c8   :  { %v726_v33 = vpop.f32.mrb[4].mxu0 }
 0x2c9   :  { %629 = vst [vmem:[#allocation7 + $0x28] sm:$0xff] %v726_v33  ;;  %v565_v62 = vpop.f32.mrb[5].mxu0 }
 0x2ca   :  { %628 = vst [vmem:[#allocation7 + $0x20] sm:$0xff] %v565_v62 }
 0x2cc   :  { %v738_v20 = vpop.f32.mrb[4].mxu1 }
 0x2cd   :  { %637 = vst [vmem:[#allocation7 + $0x68] sm:$0xff] %v738_v20  ;;  %v605_v21 = vpop.f32.mrb[5].mxu1 }
 0x2ce   :  { %636 = vst [vmem:[#allocation7 + $0x60] sm:$0xff] %v605_v21 }
 0x2d0   :  { %v729_v32 = vpop.f32.mrb[6].mxu0 }
 0x2d1   :  { %631 = vst [vmem:[#allocation7 + $0x38] sm:$0xff] %v729_v32  ;;  %v575_v1 = vpop.f32.mrb[7].mxu0 }
 0x2d2   :  { %630 = vst [vmem:[#allocation7 + $0x30] sm:$0xff] %v575_v1 }
 0x2d4   :  { %v741_v37 = vpop.f32.mrb[6].mxu1 }
 0x2d5   :  { %639 = vst [vmem:[#allocation7 + $0x78] sm:$0xff] %v741_v37  ;;  %v615_v5 = vpop.f32.mrb[7].mxu1 }
 0x2d6   :  { %638 = vst [vmem:[#allocation7 + $0x70] sm:$0xff] %v615_v5 }
 0x2d7   :  { %815 = shalt.err (!%p812_p6)
}
 0x2d8   :  { %s816_s10 = scalar_lea.hbm %s1242_s2, 2048 }
 0x2d9   :  { %p817_p7 = scmp.ne.s32.totalorder %s1242_s2, %s816_s10  ;;  %p820_p8 = scmp.lt.u32.totalorder %s816_s10, %s1242_s2 }
 0x2db   :  { %p822_p9 = pnand %p820_p8, %p817_p7 }
 0x2dd   :  { %825 = shalt.err (!%p822_p9)
}
 0x2de   :  { %651 = dma.vmem_to_hbm [thread:$0]  %s646_s6, 2048, %s1242_s2, [#allocation4], %s833_s19, %s833_s19, %s834_s20  }
 0x2df   :  { %830 = dma.done.wait [#allocation4], 2048  }
 0x2e0   :  { %831 = vsyncadd [#allocation4], 4294965248 }
 0x2e1   :  { %655 = vsyncpa [#allocation3], 1 }
 0x2e2   :  { %656 = vsyncpa [#allocation6], 1 }
 0x2e3   :  { %657 = vsyncpa [#allocation4], 1 }

</bundles_post_ra>
